<compile_context>
chip_gen: v6e
topology: v6e:2x2x1
jax: 0.10.0
libtpu: 0.0.40
codegen_flags: <defaults>
</compile_context>

<pallas_src>
import functools

import jax
import jax.numpy as jnp
from jax import lax
from jax.experimental import pallas as pl
from jax.experimental.pallas import tpu as pltpu


# ----------------------------------------------------------------------------
# Fused Transition_Block kernel: one (image, T-output-row tile) per grid step
# ----------------------------------------------------------------------------
def _transition_kernel(x_ref, w1_ref, w2_ref, w3_ref, b1_ref, b2_ref, b3_ref,
                       mask_ref, o_ref, halo_ref, *, ow):
    # x_ref : (1, 4, M, C1) bf16   parity slabs; slab p = 2*rp + cp holds
    #                              pixel (2*oh + rp, 2*ow + cp); M = T*OW
    # w*    : BN-scale-folded weights (bf16); b* : (1, C2) f32 biases
    # mask  : (M, C2) bf16, 0.0 on rows with ow == 0 (left zero padding)
    # o_ref : (1, M, 2*C2) bf16    [cv3 branch | maxpool+cv1 branch]
    # halo  : (2, OW, C2) bf16 scratch -- last output row of y10 / y11 of the
    #         tile above (persists across the sequential t axis).
    t = pl.program_id(1)
    m = x_ref.shape[2]
    c1 = x_ref.shape[3]
    c2 = w1_ref.shape[1]
    f32 = jnp.float32
    bf16 = jnp.bfloat16

    @pl.when(t == 0)
    def _():                                   # top of the image: zero halo
        halo_ref[...] = jnp.zeros_like(halo_ref)

    # read the OLD halo (from tile t-1) before it is overwritten below
    h10 = halo_ref[0]                          # (OW, C2) bf16
    h11 = halo_ref[1]

    def silu(v):
        return v * jax.nn.sigmoid(v)

    xs = x_ref[0]                              # (4, M, C1) bf16

    # ---- branch 1: 2x2 max-pool -> cv1 (1x1, BN folded) -> SiLU -------------
    pooled = jnp.maximum(jnp.maximum(xs[0], xs[1]), jnp.maximum(xs[2], xs[3]))
    x1 = silu(jnp.dot(pooled, w1_ref[...], preferred_element_type=f32)
              + b1_ref[...])

    # ---- branch 2a: cv2 (1x1, BN folded) -> SiLU, all 4 slabs in one dot ----
    y = jnp.dot(xs.reshape(4 * m, c1), w2_ref[...], preferred_element_type=f32)
    y = silu(y + b2_ref[...]).astype(bf16)     # (4M, C2)
    y00 = y[0 * m:1 * m]
    y01 = y[1 * m:2 * m]
    y10 = y[2 * m:3 * m]
    y11 = y[3 * m:4 * m]

    # save halo for the next tile of this image
    halo_ref[0] = y10[m - ow:]
    halo_ref[1] = y11[m - ow:]

    # ---- branch 2b: cv3 = 3x3 conv, stride 2, pad 1 (BN folded) -> SiLU -----
    # Output pixel (oh, ow) reads y2 rows {2oh-1, 2oh, 2oh+1} and columns
    # {2ow-1, 2ow, 2ow+1}.  In parity-slab form every tap is one of the y**
    # slabs shifted down by 0 / 1 / OW / OW+1 flattened rows; rows shifted in
    # from above the tile come from the halo (or zeros at the image top), and
    # ow == 0 rows of the kw == 0 taps are zeroed by `mask` (left padding).
    mask = mask_ref[...]                       # (M, C2) bf16
    zrow = jnp.zeros((1, c2), bf16)

    def shifted(a, prefix):                    # `prefix` rows sit above row 0
        return jnp.concatenate([prefix, a], axis=0)[:m]

    taps = (
        shifted(y11, jnp.concatenate([zrow, h11], axis=0)) * mask,  # kh0 kw0
        shifted(y10, h10),                                          # kh0 kw1
        shifted(y11, h11),                                          # kh0 kw2
        shifted(y01, zrow) * mask,                                  # kh1 kw0
        y00,                                                        # kh1 kw1
        y01,                                                        # kh1 kw2
        shifted(y11, zrow) * mask,                                  # kh2 kw0
        y10,                                                        # kh2 kw1
        y11,                                                        # kh2 kw2
    )
    # split-K accumulation: nine (M,C2)x(C2,C2) dots, f32 accumulator;
    # no (M, 9*C2) col is ever materialized in VMEM.
    acc = jnp.dot(taps[0], w3_ref[0:c2, :], preferred_element_type=f32)
    for j in range(1, 9):
        acc = acc + jnp.dot(taps[j], w3_ref[j * c2:(j + 1) * c2, :],
                            preferred_element_type=f32)
    x2 = silu(acc + b3_ref[...])

    # torch.cat([x_2, x_1], dim=1) == adjacent lane slices of one output block
    o_ref[0, :, 0:c2] = x2.astype(o_ref.dtype)
    o_ref[0, :, c2:2 * c2] = x1.astype(o_ref.dtype)


# ----------------------------------------------------------------------------
# Row-tile picker: largest divisor of OH whose bf16 input block stays within
# ~budget bytes and keeps the sublane dim (T*OW) 8-aligned.
# ----------------------------------------------------------------------------
def _pick_row_tile(oh, ow, c1, budget_bytes=2 << 20):
    per_row = 4 * ow * c1 * 2                  # bf16 parity-slab bytes / row
    t_max = max(1, budget_bytes // per_row)
    if t_max >= oh:
        return oh                              # whole image fits comfortably
    best = 0
    for t in range(1, oh):
        if oh % t == 0 and t <= t_max and (t * ow) % 8 == 0:
            best = t
    return best if best > 0 else oh


# ----------------------------------------------------------------------------
# Forward wrapper (NCHW in / NCHW out, matching the PyTorch module)
# ----------------------------------------------------------------------------
def transition_block_forward(x_nchw, p, *, out_dtype=jnp.float32):
    """x_nchw: (N, C1, H, W) float32  ->  (N, 2*C2, H//2, W//2) out_dtype."""
    N, C1, H, W = x_nchw.shape
    assert H % 2 == 0 and W % 2 == 0, "Transition_Block expects even H, W"
    OH, OW = H // 2, W // 2
    M = OH * OW
    C2 = p["w1"].shape[1]

    T = _pick_row_tile(OH, OW, C1)
    n_tiles = OH // T
    Mt = T * OW

    # Single input-layout pass.  Cast first so the transpose moves bf16 bytes,
    # then split H/W by 2x2 parity -> (N, 4, OH*OW, C1) channel-last slabs.
    x = x_nchw.astype(jnp.bfloat16)
    x = x.reshape(N, C1, OH, 2, OW, 2)
    x = jnp.transpose(x, (0, 3, 5, 2, 4, 1)).reshape(N, 4, M, C1)

    # ow == 0 (left zero-padding) mask; identical for every T-row tile, so it
    # is passed once and stays VMEM-resident (constant index_map).
    mask = (jnp.arange(Mt) % OW != 0).astype(jnp.bfloat16)
    mask = jnp.broadcast_to(mask[:, None], (Mt, C2))

    kernel = functools.partial(_transition_kernel, ow=OW)
    out = pl.pallas_call(
        kernel,
        out_shape=jax.ShapeDtypeStruct((N, M, 2 * C2), jnp.bfloat16),
        grid=(N, n_tiles),
        in_specs=[
            pl.BlockSpec((1, 4, Mt, C1), lambda n, t: (n, 0, t, 0)),
            pl.BlockSpec((C1, C2), lambda n, t: (0, 0)),
            pl.BlockSpec((C1, C2), lambda n, t: (0, 0)),
            pl.BlockSpec((9 * C2, C2), lambda n, t: (0, 0)),
            pl.BlockSpec((1, C2), lambda n, t: (0, 0)),
            pl.BlockSpec((1, C2), lambda n, t: (0, 0)),
            pl.BlockSpec((1, C2), lambda n, t: (0, 0)),
            pl.BlockSpec((Mt, C2), lambda n, t: (0, 0)),
        ],
        out_specs=pl.BlockSpec((1, Mt, 2 * C2), lambda n, t: (n, t, 0)),
        scratch_shapes=[pltpu.VMEM((2, OW, C2), jnp.bfloat16)],
        compiler_params=pltpu.CompilerParams(
            dimension_semantics=("parallel", "arbitrary"),
            vmem_limit_bytes=48 * 1024 * 1024),
    )(x, p["w1"], p["w2"], p["w3"], p["b1"], p["b2"], p["b3"], mask)

    out = out.reshape(N, OH, OW, 2 * C2)                 # free reshape
    # single output pass: bf16 read, NCHW write (dtype cast fused in).
    return jnp.transpose(out, (0, 3, 1, 2)).astype(out_dtype)


# ----------------------------------------------------------------------------
# Deterministic parameter init (shapes follow Transition_Block.__init__);
# BatchNorm (eval) folded into the conv weights, weights cast to bf16.
# ----------------------------------------------------------------------------
def init_params(key, c1, c2, dtype=jnp.float32):
    ks = jax.random.split(key, 15)
    eps = 1e-3  # BatchNorm2d eps=0.001

    def fused_bn(kg, kb, km, kv, c):
        gamma = 1.0 + 0.1 * jax.random.normal(kg, (c,), dtype)
        beta = 0.1 * jax.random.normal(kb, (c,), dtype)
        mean = 0.1 * jax.random.normal(km, (c,), dtype)
        var = jax.nn.softplus(jax.random.normal(kv, (c,), dtype)) + 0.5
        scale = gamma / jnp.sqrt(var + eps)
        bias = beta - mean * scale
        return scale, bias

    # torch layouts: cv1/cv2 Conv2d(c1, c2, 1) -> (c2, c1, 1, 1)
    #                cv3     Conv2d(c2, c2, 3) -> (c2, c2, 3, 3)
    w1_t = 0.1 * jax.random.normal(ks[0], (c2, c1, 1, 1), dtype)
    w2_t = 0.1 * jax.random.normal(ks[1], (c2, c1, 1, 1), dtype)
    w3_t = 0.1 * jax.random.normal(ks[2], (c2, c2, 3, 3), dtype)

    s1, b1 = fused_bn(ks[3], ks[4], ks[5], ks[6], c2)
    s2, b2 = fused_bn(ks[7], ks[8], ks[9], ks[10], c2)
    s3, b3 = fused_bn(ks[11], ks[12], ks[13], ks[14], c2)

    # fold BN scale into the weight columns; matmul layouts (Cin, Cout) and
    # (9*Cin, Cout) with row blocks ordered (kh, kw, cin); cast to bf16.
    w1 = (jnp.transpose(w1_t[:, :, 0, 0], (1, 0)) * s1[None, :]).astype(jnp.bfloat16)
    w2 = (jnp.transpose(w2_t[:, :, 0, 0], (1, 0)) * s2[None, :]).astype(jnp.bfloat16)
    w3 = (jnp.transpose(w3_t, (2, 3, 1, 0)).reshape(9 * c2, c2)
          * s3[None, :]).astype(jnp.bfloat16)

    return {
        "w1": w1, "w2": w2, "w3": w3,
        "b1": b1.reshape(1, c2).astype(jnp.float32),
        "b2": b2.reshape(1, c2).astype(jnp.float32),
        "b3": b3.reshape(1, c2).astype(jnp.float32),
    }


# ----------------------------------------------------------------------------
# Pure-XLA reference (same math as the PyTorch module in eval mode, with the
# kernel's numerics mirrored: bf16 inputs/weights, f32 accumulation, BN folded
# into the weights, bf16 round-trip of the cv2 activation and of the output).
# ----------------------------------------------------------------------------
def reference_forward(x_nchw, p):
    f32 = jnp.float32
    c1, c2 = p["w1"].shape
    x = jnp.transpose(x_nchw, (0, 2, 3, 1)).astype(jnp.bfloat16).astype(f32)
    dn = ("NHWC", "HWIO", "NHWC")
    w1 = p["w1"].astype(f32).reshape(1, 1, c1, c2)
    w2 = p["w2"].astype(f32).reshape(1, 1, c1, c2)
    w3 = p["w3"].astype(f32).reshape(3, 3, c2, c2)

    def silu(v):
        return v * jax.nn.sigmoid(v)

    # branch 2: cv2 -> cv3
    y2 = silu(lax.conv_general_dilated(x, w2, (1, 1), "VALID",
                                       dimension_numbers=dn)
              + p["b2"].reshape(1, 1, 1, c2))
    y2 = y2.astype(jnp.bfloat16).astype(f32)
    x2 = silu(lax.conv_general_dilated(y2, w3, (2, 2), [(1, 1), (1, 1)],
                                       dimension_numbers=dn)
              + p["b3"].reshape(1, 1, 1, c2))
    # branch 1: maxpool -> cv1
    x1 = lax.reduce_window(x, -jnp.inf, lax.max,
                           (1, 2, 2, 1), (1, 2, 2, 1), "VALID")
    x1 = silu(lax.conv_general_dilated(x1, w1, (1, 1), "VALID",
                                       dimension_numbers=dn)
              + p["b1"].reshape(1, 1, 1, c2))
    out = jnp.concatenate([x2.astype(jnp.bfloat16), x1.astype(jnp.bfloat16)],
                          axis=-1).astype(f32)            # mirror bf16 output
    return jnp.transpose(out, (0, 3, 1, 2))


# ----------------------------------------------------------------------------
if __name__ == "__main__":
    key = jax.random.PRNGKey(0)
    kx, kp = jax.random.split(key)

    N, C1, H, W = 2, 4, 16, 16
    C2 = 4

    x = jax.random.normal(kx, (N, C1, H, W), jnp.float32)
    params = init_params(kp, C1, C2)

    fwd = jax.jit(transition_block_forward)
    out = jax.block_until_ready(fwd(x, params))
    assert out.shape == (N, 2 * C2, H // 2, W // 2), out.shape

    ref = jax.block_until_ready(jax.jit(reference_forward)(x, params))
    max_err = float(jnp.max(jnp.abs(out - ref)))
    assert jnp.allclose(out, ref, atol=2e-2, rtol=2e-2), max_err

    print("KERNEL_OK")
</pallas_src>

<mosaic_0001>
module attributes {stable_mosaic.version = 11 : i64} {
  func.func @_transition_kernel(%arg0: i32, %arg1: i32, %arg2: memref<1x4x64x4xbf16, #tpu.memory_space<vmem>>, %arg3: memref<4x4xbf16, #tpu.memory_space<vmem>>, %arg4: memref<4x4xbf16, #tpu.memory_space<vmem>>, %arg5: memref<36x4xbf16, #tpu.memory_space<vmem>>, %arg6: memref<1x4xf32, #tpu.memory_space<vmem>>, %arg7: memref<1x4xf32, #tpu.memory_space<vmem>>, %arg8: memref<1x4xf32, #tpu.memory_space<vmem>>, %arg9: memref<64x4xbf16, #tpu.memory_space<vmem>>, %arg10: memref<1x64x8xbf16, #tpu.memory_space<vmem>>, %arg11: memref<2x8x4xbf16, #tpu.memory_space<vmem>>) attributes {dimension_semantics = [#tpu.dimension_semantics<parallel>, #tpu.dimension_semantics<arbitrary>], iteration_bounds = array<i64: 2, 1>, scalar_prefetch = 0 : i64, scratch_operands = 1 : i64, tpu.core_type = #tpu.core_type<tc>, window_params = [{transform_indices = @transform_0, window_bounds = array<i64: 1, 4, 64, 4>}, {pipeline_mode = #tpu.pipeline_mode<synchronous>, transform_indices = @transform_1, window_bounds = array<i64: 4, 4>}, {pipeline_mode = #tpu.pipeline_mode<synchronous>, transform_indices = @transform_2, window_bounds = array<i64: 4, 4>}, {pipeline_mode = #tpu.pipeline_mode<synchronous>, transform_indices = @transform_3, window_bounds = array<i64: 36, 4>}, {pipeline_mode = #tpu.pipeline_mode<synchronous>, transform_indices = @transform_4, window_bounds = array<i64: 1, 4>}, {pipeline_mode = #tpu.pipeline_mode<synchronous>, transform_indices = @transform_5, window_bounds = array<i64: 1, 4>}, {pipeline_mode = #tpu.pipeline_mode<synchronous>, transform_indices = @transform_6, window_bounds = array<i64: 1, 4>}, {pipeline_mode = #tpu.pipeline_mode<synchronous>, transform_indices = @transform_7, window_bounds = array<i64: 64, 4>}, {transform_indices = @transform_8, window_bounds = array<i64: 1, 64, 8>}]} {
    %c0_i32 = arith.constant 0 : i32
    %0 = arith.cmpi eq, %arg1, %c0_i32 : i32
    %1 = arith.extui %0 : i1 to i32
    %c0_i32_0 = arith.constant 0 : i32
    %2 = arith.cmpi ne, %1, %c0_i32_0 : i32
    scf.if %2 {
      %cst_57 = arith.constant 0.000000e+00 : bf16
      %115 = vector.broadcast %cst_57 : bf16 to vector<2x8x4xbf16>
      %c0_58 = arith.constant 0 : index
      %c0_59 = arith.constant 0 : index
      %c0_60 = arith.constant 0 : index
      %116 = vector.load %arg11[%c0_58, %c0_59, %c0_60] : memref<2x8x4xbf16, #tpu.memory_space<vmem>>, vector<2x8x4xbf16>
      tpu.vector_store %arg11[%c0_58, %c0_59, %c0_60], %115 {strides = array<i32>} : memref<2x8x4xbf16, #tpu.memory_space<vmem>>, vector<2x8x4xbf16>,
    } else {
    }
    %c0 = arith.constant 0 : index
    %c0_1 = arith.constant 0 : index
    %c0_2 = arith.constant 0 : index
    %3 = vector.load %arg11[%c0, %c0_1, %c0_2] : memref<2x8x4xbf16, #tpu.memory_space<vmem>>, vector<1x8x4xbf16>
    %4 = vector.shape_cast %3 : vector<1x8x4xbf16> to vector<8x4xbf16>
    %c1 = arith.constant 1 : index
    %c0_3 = arith.constant 0 : index
    %c0_4 = arith.constant 0 : index
    %5 = vector.load %arg11[%c1, %c0_3, %c0_4] : memref<2x8x4xbf16, #tpu.memory_space<vmem>>, vector<1x8x4xbf16>
    %6 = vector.shape_cast %5 : vector<1x8x4xbf16> to vector<8x4xbf16>
    %c0_5 = arith.constant 0 : index
    %c0_6 = arith.constant 0 : index
    %c0_7 = arith.constant 0 : index
    %c0_8 = arith.constant 0 : index
    %7 = vector.load %arg2[%c0_5, %c0_6, %c0_7, %c0_8] : memref<1x4x64x4xbf16, #tpu.memory_space<vmem>>, vector<1x4x64x4xbf16>
    %8 = vector.shape_cast %7 : vector<1x4x64x4xbf16> to vector<4x64x4xbf16>
    %9 = vector.extract_strided_slice %8 {offsets = [0, 0, 0], sizes = [1, 64, 4], strides = [1, 1, 1]} : vector<4x64x4xbf16> to vector<1x64x4xbf16>
    %10 = vector.shape_cast %9 : vector<1x64x4xbf16> to vector<64x4xbf16>
    %11 = vector.extract_strided_slice %8 {offsets = [1, 0, 0], sizes = [1, 64, 4], strides = [1, 1, 1]} : vector<4x64x4xbf16> to vector<1x64x4xbf16>
    %12 = vector.shape_cast %11 : vector<1x64x4xbf16> to vector<64x4xbf16>
    %13 = arith.maximumf %10, %12 : vector<64x4xbf16>
    %14 = vector.extract_strided_slice %8 {offsets = [2, 0, 0], sizes = [1, 64, 4], strides = [1, 1, 1]} : vector<4x64x4xbf16> to vector<1x64x4xbf16>
    %15 = vector.shape_cast %14 : vector<1x64x4xbf16> to vector<64x4xbf16>
    %16 = vector.extract_strided_slice %8 {offsets = [3, 0, 0], sizes = [1, 64, 4], strides = [1, 1, 1]} : vector<4x64x4xbf16> to vector<1x64x4xbf16>
    %17 = vector.shape_cast %16 : vector<1x64x4xbf16> to vector<64x4xbf16>
    %18 = arith.maximumf %15, %17 : vector<64x4xbf16>
    %19 = arith.maximumf %13, %18 : vector<64x4xbf16>
    %c0_9 = arith.constant 0 : index
    %c0_10 = arith.constant 0 : index
    %20 = vector.load %arg3[%c0_9, %c0_10] : memref<4x4xbf16, #tpu.memory_space<vmem>>, vector<4x4xbf16>
    %cst = arith.constant dense<0.000000e+00> : vector<64x4xf32>
    %21 = tpu.matmul %19, %20, %cst {dimension_numbers = #tpu.dot_dimension_numbers<[1], [0], [0], [1], [0, 0, 1, 1], [], []>} : vector<64x4xbf16>, vector<4x4xbf16>, vector<64x4xf32> -> vector<64x4xf32>
    %c0_11 = arith.constant 0 : index
    %c0_12 = arith.constant 0 : index
    %22 = vector.load %arg6[%c0_11, %c0_12] : memref<1x4xf32, #tpu.memory_space<vmem>>, vector<1x4xf32>
    %23 = vector.broadcast %22 : vector<1x4xf32> to vector<64x4xf32>
    %24 = arith.addf %21, %23 : vector<64x4xf32>
    %25 = arith.negf %24 : vector<64x4xf32>
    %26 = math.exp %25 : vector<64x4xf32>
    %cst_13 = arith.constant 1.000000e+00 : f32
    %27 = vector.broadcast %cst_13 : f32 to vector<64x4xf32>
    %28 = arith.addf %27, %26 : vector<64x4xf32>
    %29 = arith.divf %27, %28 : vector<64x4xf32>
    %30 = arith.mulf %24, %29 : vector<64x4xf32>
    %31 = vector.shape_cast %8 : vector<4x64x4xbf16> to vector<256x4xbf16>
    %c0_14 = arith.constant 0 : index
    %c0_15 = arith.constant 0 : index
    %32 = vector.load %arg4[%c0_14, %c0_15] : memref<4x4xbf16, #tpu.memory_space<vmem>>, vector<4x4xbf16>
    %cst_16 = arith.constant dense<0.000000e+00> : vector<256x4xf32>
    %33 = tpu.matmul %31, %32, %cst_16 {dimension_numbers = #tpu.dot_dimension_numbers<[1], [0], [0], [1], [0, 0, 1, 1], [], []>} : vector<256x4xbf16>, vector<4x4xbf16>, vector<256x4xf32> -> vector<256x4xf32>
    %c0_17 = arith.constant 0 : index
    %c0_18 = arith.constant 0 : index
    %34 = vector.load %arg7[%c0_17, %c0_18] : memref<1x4xf32, #tpu.memory_space<vmem>>, vector<1x4xf32>
    %35 = vector.broadcast %34 : vector<1x4xf32> to vector<256x4xf32>
    %36 = arith.addf %33, %35 : vector<256x4xf32>
    %37 = arith.negf %36 : vector<256x4xf32>
    %38 = math.exp %37 : vector<256x4xf32>
    %cst_19 = arith.constant 1.000000e+00 : f32
    %39 = vector.broadcast %cst_19 : f32 to vector<256x4xf32>
    %40 = arith.addf %39, %38 : vector<256x4xf32>
    %41 = arith.divf %39, %40 : vector<256x4xf32>
    %42 = arith.mulf %36, %41 : vector<256x4xf32>
    %43 = arith.truncf %42 : vector<256x4xf32> to vector<256x4xbf16>
    %44 = vector.extract_strided_slice %43 {offsets = [0, 0], sizes = [64, 4], strides = [1, 1]} : vector<256x4xbf16> to vector<64x4xbf16>
    %45 = vector.extract_strided_slice %43 {offsets = [64, 0], sizes = [64, 4], strides = [1, 1]} : vector<256x4xbf16> to vector<64x4xbf16>
    %46 = vector.extract_strided_slice %43 {offsets = [128, 0], sizes = [64, 4], strides = [1, 1]} : vector<256x4xbf16> to vector<64x4xbf16>
    %47 = vector.extract_strided_slice %43 {offsets = [192, 0], sizes = [64, 4], strides = [1, 1]} : vector<256x4xbf16> to vector<64x4xbf16>
    %48 = vector.extract_strided_slice %46 {offsets = [56, 0], sizes = [8, 4], strides = [1, 1]} : vector<64x4xbf16> to vector<8x4xbf16>
    %c0_20 = arith.constant 0 : index
    %c0_21 = arith.constant 0 : index
    %c0_22 = arith.constant 0 : index
    %49 = vector.load %arg11[%c0_20, %c0_21, %c0_22] : memref<2x8x4xbf16, #tpu.memory_space<vmem>>, vector<1x8x4xbf16>
    %50 = vector.shape_cast %49 : vector<1x8x4xbf16> to vector<8x4xbf16>
    %51 = vector.shape_cast %48 : vector<8x4xbf16> to vector<1x8x4xbf16>
    tpu.vector_store %arg11[%c0_20, %c0_21, %c0_22], %51 {strides = array<i32>} : memref<2x8x4xbf16, #tpu.memory_space<vmem>>, vector<1x8x4xbf16>,
    %52 = vector.extract_strided_slice %47 {offsets = [56, 0], sizes = [8, 4], strides = [1, 1]} : vector<64x4xbf16> to vector<8x4xbf16>
    %c1_23 = arith.constant 1 : index
    %c0_24 = arith.constant 0 : index
    %c0_25 = arith.constant 0 : index
    %53 = vector.load %arg11[%c1_23, %c0_24, %c0_25] : memref<2x8x4xbf16, #tpu.memory_space<vmem>>, vector<1x8x4xbf16>
    %54 = vector.shape_cast %53 : vector<1x8x4xbf16> to vector<8x4xbf16>
    %55 = vector.shape_cast %52 : vector<8x4xbf16> to vector<1x8x4xbf16>
    tpu.vector_store %arg11[%c1_23, %c0_24, %c0_25], %55 {strides = array<i32>} : memref<2x8x4xbf16, #tpu.memory_space<vmem>>, vector<1x8x4xbf16>,
    %c0_26 = arith.constant 0 : index
    %c0_27 = arith.constant 0 : index
    %56 = vector.load %arg9[%c0_26, %c0_27] : memref<64x4xbf16, #tpu.memory_space<vmem>>, vector<64x4xbf16>
    %cst_28 = arith.constant 0.000000e+00 : bf16
    %57 = vector.broadcast %cst_28 : bf16 to vector<1x4xbf16>
    %58 = tpu.concatenate %57, %6 in 0 : vector<1x4xbf16>, vector<8x4xbf16> -> vector<9x4xbf16>
    %59 = tpu.concatenate %58, %47 in 0 : vector<9x4xbf16>, vector<64x4xbf16> -> vector<73x4xbf16>
    %60 = vector.extract_strided_slice %59 {offsets = [0, 0], sizes = [64, 4], strides = [1, 1]} : vector<73x4xbf16> to vector<64x4xbf16>
    %61 = arith.mulf %60, %56 : vector<64x4xbf16>
    %62 = tpu.concatenate %4, %46 in 0 : vector<8x4xbf16>, vector<64x4xbf16> -> vector<72x4xbf16>
    %63 = vector.extract_strided_slice %62 {offsets = [0, 0], sizes = [64, 4], strides = [1, 1]} : vector<72x4xbf16> to vector<64x4xbf16>
    %64 = tpu.concatenate %6, %47 in 0 : vector<8x4xbf16>, vector<64x4xbf16> -> vector<72x4xbf16>
    %65 = vector.extract_strided_slice %64 {offsets = [0, 0], sizes = [64, 4], strides = [1, 1]} : vector<72x4xbf16> to vector<64x4xbf16>
    %66 = tpu.concatenate %57, %45 in 0 : vector<1x4xbf16>, vector<64x4xbf16> -> vector<65x4xbf16>
    %67 = vector.extract_strided_slice %66 {offsets = [0, 0], sizes = [64, 4], strides = [1, 1]} : vector<65x4xbf16> to vector<64x4xbf16>
    %68 = arith.mulf %67, %56 : vector<64x4xbf16>
    %69 = tpu.concatenate %57, %47 in 0 : vector<1x4xbf16>, vector<64x4xbf16> -> vector<65x4xbf16>
    %70 = vector.extract_strided_slice %69 {offsets = [0, 0], sizes = [64, 4], strides = [1, 1]} : vector<65x4xbf16> to vector<64x4xbf16>
    %71 = arith.mulf %70, %56 : vector<64x4xbf16>
    %c0_29 = arith.constant 0 : index
    %c0_30 = arith.constant 0 : index
    %72 = vector.load %arg5[%c0_29, %c0_30] : memref<36x4xbf16, #tpu.memory_space<vmem>>, vector<4x4xbf16>
    %cst_31 = arith.constant dense<0.000000e+00> : vector<64x4xf32>
    %73 = tpu.matmul %61, %72, %cst_31 {dimension_numbers = #tpu.dot_dimension_numbers<[1], [0], [0], [1], [0, 0, 1, 1], [], []>} : vector<64x4xbf16>, vector<4x4xbf16>, vector<64x4xf32> -> vector<64x4xf32>
    %c4 = arith.constant 4 : index
    %c0_32 = arith.constant 0 : index
    %74 = vector.load %arg5[%c4, %c0_32] : memref<36x4xbf16, #tpu.memory_space<vmem>>, vector<4x4xbf16>
    %cst_33 = arith.constant dense<0.000000e+00> : vector<64x4xf32>
    %75 = tpu.matmul %63, %74, %cst_33 {dimension_numbers = #tpu.dot_dimension_numbers<[1], [0], [0], [1], [0, 0, 1, 1], [], []>} : vector<64x4xbf16>, vector<4x4xbf16>, vector<64x4xf32> -> vector<64x4xf32>
    %76 = arith.addf %73, %75 : vector<64x4xf32>
    %c8 = arith.constant 8 : index
    %c0_34 = arith.constant 0 : index
    %77 = vector.load %arg5[%c8, %c0_34] : memref<36x4xbf16, #tpu.memory_space<vmem>>, vector<4x4xbf16>
    %cst_35 = arith.constant dense<0.000000e+00> : vector<64x4xf32>
    %78 = tpu.matmul %65, %77, %cst_35 {dimension_numbers = #tpu.dot_dimension_numbers<[1], [0], [0], [1], [0, 0, 1, 1], [], []>} : vector<64x4xbf16>, vector<4x4xbf16>, vector<64x4xf32> -> vector<64x4xf32>
    %79 = arith.addf %76, %78 : vector<64x4xf32>
    %c12 = arith.constant 12 : index
    %c0_36 = arith.constant 0 : index
    %80 = vector.load %arg5[%c12, %c0_36] : memref<36x4xbf16, #tpu.memory_space<vmem>>, vector<4x4xbf16>
    %cst_37 = arith.constant dense<0.000000e+00> : vector<64x4xf32>
    %81 = tpu.matmul %68, %80, %cst_37 {dimension_numbers = #tpu.dot_dimension_numbers<[1], [0], [0], [1], [0, 0, 1, 1], [], []>} : vector<64x4xbf16>, vector<4x4xbf16>, vector<64x4xf32> -> vector<64x4xf32>
    %82 = arith.addf %79, %81 : vector<64x4xf32>
    %c16 = arith.constant 16 : index
    %c0_38 = arith.constant 0 : index
    %83 = vector.load %arg5[%c16, %c0_38] : memref<36x4xbf16, #tpu.memory_space<vmem>>, vector<4x4xbf16>
    %cst_39 = arith.constant dense<0.000000e+00> : vector<64x4xf32>
    %84 = tpu.matmul %44, %83, %cst_39 {dimension_numbers = #tpu.dot_dimension_numbers<[1], [0], [0], [1], [0, 0, 1, 1], [], []>} : vector<64x4xbf16>, vector<4x4xbf16>, vector<64x4xf32> -> vector<64x4xf32>
    %85 = arith.addf %82, %84 : vector<64x4xf32>
    %c20 = arith.constant 20 : index
    %c0_40 = arith.constant 0 : index
    %86 = vector.load %arg5[%c20, %c0_40] : memref<36x4xbf16, #tpu.memory_space<vmem>>, vector<4x4xbf16>
    %cst_41 = arith.constant dense<0.000000e+00> : vector<64x4xf32>
    %87 = tpu.matmul %45, %86, %cst_41 {dimension_numbers = #tpu.dot_dimension_numbers<[1], [0], [0], [1], [0, 0, 1, 1], [], []>} : vector<64x4xbf16>, vector<4x4xbf16>, vector<64x4xf32> -> vector<64x4xf32>
    %88 = arith.addf %85, %87 : vector<64x4xf32>
    %c24 = arith.constant 24 : index
    %c0_42 = arith.constant 0 : index
    %89 = vector.load %arg5[%c24, %c0_42] : memref<36x4xbf16, #tpu.memory_space<vmem>>, vector<4x4xbf16>
    %cst_43 = arith.constant dense<0.000000e+00> : vector<64x4xf32>
    %90 = tpu.matmul %71, %89, %cst_43 {dimension_numbers = #tpu.dot_dimension_numbers<[1], [0], [0], [1], [0, 0, 1, 1], [], []>} : vector<64x4xbf16>, vector<4x4xbf16>, vector<64x4xf32> -> vector<64x4xf32>
    %91 = arith.addf %88, %90 : vector<64x4xf32>
    %c28 = arith.constant 28 : index
    %c0_44 = arith.constant 0 : index
    %92 = vector.load %arg5[%c28, %c0_44] : memref<36x4xbf16, #tpu.memory_space<vmem>>, vector<4x4xbf16>
    %cst_45 = arith.constant dense<0.000000e+00> : vector<64x4xf32>
    %93 = tpu.matmul %46, %92, %cst_45 {dimension_numbers = #tpu.dot_dimension_numbers<[1], [0], [0], [1], [0, 0, 1, 1], [], []>} : vector<64x4xbf16>, vector<4x4xbf16>, vector<64x4xf32> -> vector<64x4xf32>
    %94 = arith.addf %91, %93 : vector<64x4xf32>
    %c32 = arith.constant 32 : index
    %c0_46 = arith.constant 0 : index
    %95 = vector.load %arg5[%c32, %c0_46] : memref<36x4xbf16, #tpu.memory_space<vmem>>, vector<4x4xbf16>
    %cst_47 = arith.constant dense<0.000000e+00> : vector<64x4xf32>
    %96 = tpu.matmul %47, %95, %cst_47 {dimension_numbers = #tpu.dot_dimension_numbers<[1], [0], [0], [1], [0, 0, 1, 1], [], []>} : vector<64x4xbf16>, vector<4x4xbf16>, vector<64x4xf32> -> vector<64x4xf32>
    %97 = arith.addf %94, %96 : vector<64x4xf32>
    %c0_48 = arith.constant 0 : index
    %c0_49 = arith.constant 0 : index
    %98 = vector.load %arg8[%c0_48, %c0_49] : memref<1x4xf32, #tpu.memory_space<vmem>>, vector<1x4xf32>
    %99 = vector.broadcast %98 : vector<1x4xf32> to vector<64x4xf32>
    %100 = arith.addf %97, %99 : vector<64x4xf32>
    %101 = arith.negf %100 : vector<64x4xf32>
    %102 = math.exp %101 : vector<64x4xf32>
    %cst_50 = arith.constant 1.000000e+00 : f32
    %103 = vector.broadcast %cst_50 : f32 to vector<64x4xf32>
    %104 = arith.addf %103, %102 : vector<64x4xf32>
    %105 = arith.divf %103, %104 : vector<64x4xf32>
    %106 = arith.mulf %100, %105 : vector<64x4xf32>
    %107 = arith.truncf %106 : vector<64x4xf32> to vector<64x4xbf16>
    %c0_51 = arith.constant 0 : index
    %c0_52 = arith.constant 0 : index
    %c0_53 = arith.constant 0 : index
    %108 = vector.load %arg10[%c0_51, %c0_52, %c0_53] : memref<1x64x8xbf16, #tpu.memory_space<vmem>>, vector<1x64x4xbf16>
    %109 = vector.shape_cast %108 : vector<1x64x4xbf16> to vector<64x4xbf16>
    %110 = vector.shape_cast %107 : vector<64x4xbf16> to vector<1x64x4xbf16>
    tpu.vector_store %arg10[%c0_51, %c0_52, %c0_53], %110 {strides = array<i32>} : memref<1x64x8xbf16, #tpu.memory_space<vmem>>, vector<1x64x4xbf16>,
    %111 = arith.truncf %30 : vector<64x4xf32> to vector<64x4xbf16>
    %c0_54 = arith.constant 0 : index
    %c0_55 = arith.constant 0 : index
    %c4_56 = arith.constant 4 : index
    %112 = vector.load %arg10[%c0_54, %c0_55, %c4_56] : memref<1x64x8xbf16, #tpu.memory_space<vmem>>, vector<1x64x4xbf16>
    %113 = vector.shape_cast %112 : vector<1x64x4xbf16> to vector<64x4xbf16>
    %114 = vector.shape_cast %111 : vector<64x4xbf16> to vector<1x64x4xbf16>
    tpu.vector_store %arg10[%c0_54, %c0_55, %c4_56], %114 {strides = array<i32>} : memref<1x64x8xbf16, #tpu.memory_space<vmem>>, vector<1x64x4xbf16>,
    return
  }
  func.func @transform_0(%arg0: i32, %arg1: i32) -> (i32, i32, i32, i32) {
    %c0_i32 = arith.constant 0 : i32
    %c0_i32_0 = arith.constant 0 : i32
    %c0_i32_1 = arith.constant 0 : i32
    return %arg0, %c0_i32, %arg1, %c0_i32_0 : i32, i32, i32, i32
  }
  func.func @transform_1(%arg0: i32, %arg1: i32) -> (i32, i32) {
    %c0_i32 = arith.constant 0 : i32
    %c0_i32_0 = arith.constant 0 : i32
    %c0_i32_1 = arith.constant 0 : i32
    return %c0_i32, %c0_i32_0 : i32, i32
  }
  func.func @transform_2(%arg0: i32, %arg1: i32) -> (i32, i32) {
    %c0_i32 = arith.constant 0 : i32
    %c0_i32_0 = arith.constant 0 : i32
    %c0_i32_1 = arith.constant 0 : i32
    return %c0_i32, %c0_i32_0 : i32, i32
  }
  func.func @transform_3(%arg0: i32, %arg1: i32) -> (i32, i32) {
    %c0_i32 = arith.constant 0 : i32
    %c0_i32_0 = arith.constant 0 : i32
    %c0_i32_1 = arith.constant 0 : i32
    return %c0_i32, %c0_i32_0 : i32, i32
  }
  func.func @transform_4(%arg0: i32, %arg1: i32) -> (i32, i32) {
    %c0_i32 = arith.constant 0 : i32
    %c0_i32_0 = arith.constant 0 : i32
    %c0_i32_1 = arith.constant 0 : i32
    return %c0_i32, %c0_i32_0 : i32, i32
  }
  func.func @transform_5(%arg0: i32, %arg1: i32) -> (i32, i32) {
    %c0_i32 = arith.constant 0 : i32
    %c0_i32_0 = arith.constant 0 : i32
    %c0_i32_1 = arith.constant 0 : i32
    return %c0_i32, %c0_i32_0 : i32, i32
  }
  func.func @transform_6(%arg0: i32, %arg1: i32) -> (i32, i32) {
    %c0_i32 = arith.constant 0 : i32
    %c0_i32_0 = arith.constant 0 : i32
    %c0_i32_1 = arith.constant 0 : i32
    return %c0_i32, %c0_i32_0 : i32, i32
  }
  func.func @transform_7(%arg0: i32, %arg1: i32) -> (i32, i32) {
    %c0_i32 = arith.constant 0 : i32
    %c0_i32_0 = arith.constant 0 : i32
    %c0_i32_1 = arith.constant 0 : i32
    return %c0_i32, %c0_i32_0 : i32, i32
  }
  func.func @transform_8(%arg0: i32, %arg1: i32) -> (i32, i32, i32) {
    %c0_i32 = arith.constant 0 : i32
    %c0_i32_0 = arith.constant 0 : i32
    return %arg0, %arg1, %c0_i32 : i32, i32, i32
  }
}

</mosaic_0001>

<bundles_post_ra>
// kernel: transition_block_forward.1
= control target key start
LH: loop header
LB: loop body
LE: loop exit
PB: predicated region body
PF: predicated region fallthrough
CT: control target
= control target key end

     0   :  { %s3067_s27 = smov 0   ;;  %s3069_s28 = smov 0   ;;  %s3807_s0 = inlined_call_operand.vmem [shape: bf16[2,4,64,4], index: 0, kind: input, shape index: {}]   ;;  %s3808_s1 = inlined_call_operand.vmem [shape: bf16[4,4], index: 1, kind: input, shape index: {}]   ;;  %s3809_s2 = inlined_call_operand.vmem [shape: bf16[4,4], index: 2, kind: input, shape index: {}]   ;;  %s3810_s3 = inlined_call_operand.vmem [shape: bf16[36,4], index: 3, kind: input, shape index: {}]   ;;  %s3811_s4 = inlined_call_operand.vmem [shape: f32[1,4], index: 4, kind: input, shape index: {}]   ;;  %s3812_s5 = inlined_call_operand.vmem [shape: f32[1,4], index: 5, kind: input, shape index: {}]   ;;  %s3813_s6 = inlined_call_operand.vmem [shape: f32[1,4], index: 6, kind: input, shape index: {}]   ;;  %s3814_s7 = inlined_call_operand.vmem [shape: bf16[64,4], index: 7, kind: input, shape index: {}]   ;;  %s3815_s8 = inlined_call_operand.vmem [shape: bf16[2,64,8], index: 8, kind: output, shape index: {}]  }
   0x1   :  { %s3071_s29 = smov 0  }
   0x2 LB: > { %s30_s30 = sadd.s32 1, %s3014_s28  ;;  %p2361_p0 = scmp.ge.s32.totalorder %s3018_s29, 1  ;;  %s3018_s29 = sphi %s3071_s29, %s18_s29   ;;  %s3014_s28 = sphi %s3069_s28, %s3827_s28   ;;  %s3010_s27 = sphi %s3067_s27, %s3826_s27  }
   0x3   : > { %p32_p1 = scmp.ge.s32.totalorder %s30_s30, 2  ;;  %p283_p2 = scmp.lt.s32.totalorder %s3018_s29, 3 }
   0x5   : > { %s3829_s30 = smov (%p32_p1, %s30_s30), 0  ;;  %p284_p3 = pnand %p2361_p0, %p283_p2 }
   0x7   : > { %287 = sbr.rel (%p284_p3) target bundleno = 636 (0x27c), region = 52 }
   0xc   : > { %vm453_vm0 = vcmask 1041408   ;;  %v578_v0 = vld [vmem:[%s3809_s2] sm:$0x3]  ;;  %p326_p4 = scmp.lt.s32.totalorder %s3010_s27, 1  ;;  %vm440_vm1 = vcmask 31744   ;;  %vm350_vm2 = vcmask 27648  }
   0xd   : > { %2744 = vmatprep.subr.msk.bf16.mxu1 %vm453_vm0, %v578_v0  ;;  %v715_v1 = vsel %vm453_vm0, %v578_v0, 0  ;;  %v412_v58 = vld [vmem:[%s3808_s1] sm:$0x3]  ;;  %vm1149_vm3 = vsmask.f32 256  ;;  %vm1226_vm4 = vcmask 1043456  }
   0xe   : > { %2620 = vmatpush3.bf16.msra.mxu1 %v715_v1  ;;  %s3831_s27 = smov (!%p326_p4, %s3010_s27), 1  ;;  %2743 = vmatprep.subr.msk.bf16.mxu0 %vm453_vm0, %v412_v58  ;;  %v455_v61 = vsel %vm453_vm0, %v412_v58, 0  ;;  %vm1148_vm5 = vcmask 1040384   ;;  %vm1152_vm6 = vsmask.f32 4352  ;;  %vm1192_vm8 = vcmask 1044480  }
   0xf   : > { %s2522_s11 = sshll.u32 %s3831_s27, 7  ;;  %2610 = vmatpush3.bf16.msra.mxu0 %v455_v61  ;;  %vm3522_vm7 = vmand %vm1148_vm5, %vm1149_vm3  ;;  %s3021_s9 = smov 4   ;;  %vm2261_vm10 = vcmask 60448  }
  0x10   : > { %s3096_s14 = scalar_lea.vmem %s3807_s0, %s2522_s11  ;;  %vm1193_vm9 = vmand %vm1192_vm8, %vm1152_vm6 }
  0x11   : > { %v3099_v2 = vld [vmem:[%s3096_s14] sm:$0xf]  ;;  %v3102_v3 = vld [vmem:[%s3096_s14 + $0x4] sm:$0xf]  ;;  %v3107_v5 = vld [vmem:[%s3096_s14 + $0x8] sm:$0xf] }
  0x12   : > { %v2384_v4 = vcombine.low %v3099_v2, %v3102_v3  ;;  %v3110_v6 = vld [vmem:[%s3096_s14 + $0xc] sm:$0xf]  ;;  %v3115_v8 = vld [vmem:[%s3096_s14 + $0x10] sm:$0xf]  ;;  %v3118_v9 = vld [vmem:[%s3096_s14 + $0x14] sm:$0xf] }
  0x13   : > { %v2385_v7 = vcombine.low %v3107_v5, %v3110_v6  ;;  %v2386_v10 = vcombine.low %v3115_v8, %v3118_v9  ;;  %v3126_v11 = vld [vmem:[%s3096_s14 + $0x18] sm:$0xf]  ;;  %v3129_v12 = vld [vmem:[%s3096_s14 + $0x1c] sm:$0xf]  ;;  %v364_v13 = vld [vmem:[%s3096_s14 + $0x20] sm:$0xf] }
  0x14   : > { %2621 = vmatprep.mubr.msk.bf16.mxu1 %vm440_vm1, %v2384_v4  ;;  %v365_v14 = vld [vmem:[%s3096_s14 + $0x24] sm:$0xf]  ;;  %v2387_v15 = vcombine.low %v3126_v11, %v3129_v12  ;;  %v366_v17 = vld [vmem:[%s3096_s14 + $0x28] sm:$0xf]  ;;  %v367_v18 = vld [vmem:[%s3096_s14 + $0x2c] sm:$0xf]  ;;  %v388_v50 = vmax.bf16 %v364_v13, %v3099_v2 }
  0x15   : > { %2622 = vmatmul.mubr.msk.bf16.vlgmr.msra.gmra.mxu1 %vm440_vm1, %v2385_v7  ;;  %v2388_v16 = vcombine.low %v364_v13, %v365_v14  ;;  %v3140_v19 = vld [vmem:[%s3096_s14 + $0x30] sm:$0xf]  ;;  %v3143_v20 = vld [vmem:[%s3096_s14 + $0x34] sm:$0xf]  ;;  %v2389_v21 = vcombine.low %v366_v17, %v367_v18  ;;  %v3150_v23 = vld [vmem:[%s3096_s14 + $0x38] sm:$0xf]  ;;  %v389_v51 = vmax.bf16 %v365_v14, %v3102_v3  ;;  %v390_v52 = vmax.bf16 %v366_v17, %v3107_v5 }
  0x16   : > { %2625 = vmatprep.mubr.msk.bf16.mxu1 %vm440_vm1, %v2386_v10  ;;  %v2390_v22 = vcombine.low %v3140_v19, %v3143_v20  ;;  %v3153_v24 = vld [vmem:[%s3096_s14 + $0x3c] sm:$0xf]  ;;  %v372_v25 = vld [vmem:[%s3096_s14 + $0x40] sm:$0xf]  ;;  %v373_v26 = vld [vmem:[%s3096_s14 + $0x44] sm:$0xf]  ;;  %v391_v53 = vmax.bf16 %v367_v18, %v3110_v6  ;;  %v392_v2 = vmax.bf16 %v3140_v19, %v3115_v8  ;;  %v393_v3 = vmax.bf16 %v3143_v20, %v3118_v9 }
  0x17   : > { %v2391_v27 = vcombine.low %v3150_v23, %v3153_v24  ;;  %v2392_v28 = vcombine.low %v372_v25, %v373_v26  ;;  %v374_v29 = vld [vmem:[%s3096_s14 + $0x48] sm:$0xf]  ;;  %v375_v30 = vld [vmem:[%s3096_s14 + $0x4c] sm:$0xf]  ;;  %v376_v31 = vld [vmem:[%s3096_s14 + $0x50] sm:$0xf]  ;;  %v394_v6 = vmax.bf16 %v3150_v23, %v3126_v11  ;;  %v395_v7 = vmax.bf16 %v3153_v24, %v3129_v12 }
  0x18   : > { %v377_v32 = vld [vmem:[%s3096_s14 + $0x54] sm:$0xf]  ;;  %v2393_v33 = vcombine.low %v374_v29, %v375_v30  ;;  %v378_v35 = vld [vmem:[%s3096_s14 + $0x58] sm:$0xf]  ;;  %v379_v36 = vld [vmem:[%s3096_s14 + $0x5c] sm:$0xf] }
  0x19   : > { %v2394_v34 = vcombine.low %v376_v31, %v377_v32  ;;  %v380_v37 = vld [vmem:[%s3096_s14 + $0x60] sm:$0xf]  ;;  %v381_v38 = vld [vmem:[%s3096_s14 + $0x64] sm:$0xf]  ;;  %v2395_v39 = vcombine.low %v378_v35, %v379_v36  ;;  %v382_v41 = vld [vmem:[%s3096_s14 + $0x68] sm:$0xf] }
  0x1a   : > { %v2396_v40 = vcombine.low %v380_v37, %v381_v38  ;;  %v383_v42 = vld [vmem:[%s3096_s14 + $0x6c] sm:$0xf]  ;;  %v384_v43 = vld [vmem:[%s3096_s14 + $0x70] sm:$0xf]  ;;  %v385_v44 = vld [vmem:[%s3096_s14 + $0x74] sm:$0xf]  ;;  %v398_v54 = vmax.bf16 %v382_v41, %v374_v29  ;;  %v396_v56 = vmax.bf16 %v380_v37, %v372_v25  ;;  %v397_v57 = vmax.bf16 %v381_v38, %v373_v26 }
  0x1b   : > { %v2397_v45 = vcombine.low %v382_v41, %v383_v42  ;;  %v2398_v46 = vcombine.low %v384_v43, %v385_v44  ;;  %v386_v47 = vld [vmem:[%s3096_s14 + $0x78] sm:$0xf]  ;;  %v387_v48 = vld [vmem:[%s3096_s14 + $0x7c] sm:$0xf]  ;;  %v399_v55 = vmax.bf16 %v383_v42, %v375_v30  ;;  %v400_v4 = vmax.bf16 %v384_v43, %v376_v31  ;;  %v1657_v9 = vld [vmem:[%s3810_s3 + $0x8] sm:$0x3] }
  0x1c   : > { %v2399_v49 = vcombine.low %v386_v47, %v387_v48  ;;  %v404_v59 = vmax.bf16 %v396_v56, %v388_v50  ;;  %v405_v60 = vmax.bf16 %v397_v57, %v389_v51  ;;  %v406_v62 = vmax.bf16 %v398_v54, %v390_v52  ;;  %2749 = vmatprep.subr.msk.bf16.mxu1 %vm453_vm0, %v1657_v9  ;;  %v2797_v19 = vld [vmem:[%s3810_s3] ss:$0 sps:$4 sm:$0xcc]   ;;  %v3223_v23 = vld [vmem:[%s3810_s3 + $0xc] sm:$0x3]  ;;  %s2523_s14 = sshll.u32 %s3831_s27, 5 }
  0x1d   : > { %2626 = vmatmul.mubr.msk.bf16.gmra.mxu1 %vm440_vm1, %v2387_v15  ;;  %v407_v63 = vmax.bf16 %v399_v55, %v391_v53  ;;  %v401_v5 = vmax.bf16 %v385_v44, %v377_v32  ;;  %v402_v10 = vmax.bf16 %v386_v47, %v378_v35  ;;  %v403_v13 = vmax.bf16 %v387_v48, %v379_v36  ;;  %v3232_v24 = vld [vmem:[%s3812_s5] ss:$0 sm:$0xff]  ;;  %s3757_s17 = scalar_lea.vmem %s3815_s8, %s2523_s14 }
  0x1e   : > { %2629 = vmatprep.mubr.msk.bf16.mxu1 %vm440_vm1, %v2388_v16  ;;  %v2367_v0 = vcombine.low %v404_v59, %v405_v60  ;;  %v408_v14 = vmax.bf16 %v400_v4, %v392_v2  ;;  %v1671_v11 = vsel %vm453_vm0, %v1657_v9, 0  ;;  %v3020_v12 = vmov 0  }
  0x1f   : > { %v2368_v1 = vcombine.low %v406_v62, %v407_v63  ;;  %v409_v15 = vmax.bf16 %v401_v5, %v393_v3  ;;  %v410_v16 = vmax.bf16 %v402_v10, %v394_v6  ;;  %v411_v17 = vmax.bf16 %v403_v13, %v395_v7  ;;  %2694 = vmatpush3.bf16.msra.mxu1 %v1671_v11 }
  0x20   : > { %2611 = vmatprep.mubr.msk.bf16.mxu0 %vm440_vm1, %v2367_v0  ;;  %352 = vst.msk [vmem:[#allocation2 + $0x4] sm:$0xf] %vm350_vm2, %v3020_v12  ;;  %351 = vst.msk [vmem:[#allocation2] sm:$0xf] %vm350_vm2, %v3020_v12  ;;  %v1316_v20 = vrot.slane %v2797_v19, 2  ;;  %2751 = vmatprep.subr.msk.bf16.mxu1 %vm453_vm0, %v3223_v23 }
  0x21   : > { %2612 = vmatmul.mubr.msk.bf16.vlgmr.msra.gmra.mxu0 %vm440_vm1, %v2368_v1  ;;  %v2369_v8 = vcombine.low %v408_v14, %v409_v15  ;;  %v2370_v18 = vcombine.low %v410_v16, %v411_v17 }
  0x22   : > { %2745 = vmatprep.subr.msk.bf16.mxu0 %vm453_vm0, %v1316_v20 }
  0x23   : > { %2615 = vmatprep.mubr.msk.bf16.mxu0 %vm440_vm1, %v2369_v8 }
  0x25   : > { %2630 = vmatmul.mubr.msk.bf16.gmra.mxu1 %vm440_vm1, %v2389_v21  ;;  %v1329_v21 = vsel %vm453_vm0, %v1316_v20, 0 }
  0x26   : > { %2633 = vmatprep.mubr.msk.bf16.mxu1 %vm440_vm1, %v2390_v22  ;;  %2654 = vmatpush3.bf16.msra.mxu0 %v1329_v21  ;;  %v3218_v22 = vld [vmem:[%s3810_s3] sm:$0x3] }
  0x27   : > { %2746 = vmatprep.subr.msk.bf16.mxu0 %vm453_vm0, %v3218_v22 }
  0x29   : > { %2616 = vmatmul.mubr.msk.bf16.gmra.mxu0 %vm440_vm1, %v2370_v18 }
  0x2d   : > { %2634 = vmatmul.mubr.msk.bf16.gmra.mxu1 %vm440_vm1, %v2391_v27 }
  0x2e   : > { %2637 = vmatprep.mubr.msk.bf16.mxu1 %vm440_vm1, %v2392_v28 }
  0x35   : > { %2638 = vmatmul.mubr.msk.bf16.gmra.mxu1 %vm440_vm1, %v2393_v33 }
  0x36   : > { %2641 = vmatprep.mubr.msk.bf16.mxu1 %vm440_vm1, %v2394_v34 }
  0x3d   : > { %2642 = vmatmul.mubr.msk.bf16.gmra.mxu1 %vm440_vm1, %v2395_v39 }
  0x3e   : > { %2645 = vmatprep.mubr.msk.bf16.mxu1 %vm440_vm1, %v2396_v40 }
  0x45   : > { %2646 = vmatmul.mubr.msk.bf16.gmra.mxu1 %vm440_vm1, %v2397_v45 }
  0x46   : > { %2649 = vmatprep.mubr.msk.bf16.mxu1 %vm440_vm1, %v2398_v46 }
  0x4d   : > { %2650 = vmatmul.mubr.msk.bf16.gmra.mxu1 %vm440_vm1, %v2399_v49 }
  0xd5   : > { %v2623_v25 = vpop.f32.mrf.mxu1 }
  0xd6   : > { %v3235_v26 = vadd.f32 %v2623_v25, %v3232_v24 }
  0xd7   : > { %v751_v27 = vpop.f32.mrf.mxu1 }
  0xd8   : > { %v2418_v28 = vmul.f32 -1.442695, %v3235_v26  ;;  %v3239_v29 = vadd.f32 %v3232_v24, %v751_v27 }
  0xd9   : > { %v2624_v30 = vpop.f32.mrf.mxu1 }
  0xda   : > { %2804 = vpow2.f32 %v2418_v28  ;;  %v2416_v31 = vmul.f32 -1.442695, %v3239_v29  ;;  %v3243_v32 = vadd.f32 %v2624_v30, %v3232_v24 }
  0xdb   : > { %v754_v33 = vpop.f32.mrf.mxu1 }
  0xdc   : > { %2806 = vpow2.f32 %v2416_v31  ;;  %v2419_v34 = vmul.f32 -1.442695, %v3243_v32  ;;  %v3247_v35 = vadd.f32 %v3232_v24, %v754_v33 }
  0xdd   : > { %v2627_v36 = vpop.f32.mrf.mxu1 }
  0xde   : > { %2808 = vpow2.f32 %v2419_v34  ;;  %v2417_v37 = vmul.f32 -1.442695, %v3247_v35  ;;  %v3251_v38 = vadd.f32 %v2627_v36, %v3232_v24 }
  0xdf   : > { %v767_v39 = vpop.f32.mrf.mxu1 }
  0xe0   : > { %2810 = vpow2.f32 %v2417_v37  ;;  %v2422_v40 = vmul.f32 -1.442695, %v3251_v38  ;;  %v3255_v41 = vadd.f32 %v3232_v24, %v767_v39 }
  0xe1   : > { %v2628_v42 = vpop.f32.mrf.mxu1 }
  0xe2   : > { %2812 = vpow2.f32 %v2422_v40  ;;  %v2420_v43 = vmul.f32 -1.442695, %v3255_v41  ;;  %v3259_v44 = vadd.f32 %v2628_v42, %v3232_v24 }
  0xe3   : > { %v770_v45 = vpop.f32.mrf.mxu1 }
  0xe4   : > { %2814 = vpow2.f32 %v2420_v43  ;;  %v2423_v46 = vmul.f32 -1.442695, %v3259_v44  ;;  %v3263_v47 = vadd.f32 %v3232_v24, %v770_v45 }
  0xe5   : > { %v2631_v48 = vpop.f32.mrf.mxu1 }
  0xe6   : > { %2816 = vpow2.f32 %v2423_v46  ;;  %v2421_v49 = vmul.f32 -1.442695, %v3263_v47  ;;  %v3267_v50 = vadd.f32 %v2631_v48, %v3232_v24 }
  0xe7   : > { %v2805_v51 = vpop.eup %2804  ;;  %v783_v52 = vpop.f32.mrf.mxu1 }
  0xe8   : > { %v976_v53 = vadd.f32 1.0, %v2805_v51  ;;  %2818 = vpow2.f32 %v2421_v49  ;;  %v2426_v54 = vmul.f32 -1.442695, %v3267_v50  ;;  %v3271_v55 = vadd.f32 %v3232_v24, %v783_v52 }
  0xe9   : > { %v2807_v56 = vpop.eup %2806  ;;  %v2632_v57 = vpop.f32.mrf.mxu1 }
  0xea   : > { %2820 = vrcp.f32 %v976_v53  ;;  %v974_v58 = vadd.f32 1.0, %v2807_v56  ;;  %v2424_v59 = vmul.f32 -1.442695, %v3271_v55  ;;  %v3275_v60 = vadd.f32 %v2632_v57, %v3232_v24 }
  0xeb   : > { %v2809_v61 = vpop.eup %2808  ;;  %2822 = vpow2.f32 %v2426_v54  ;;  %v786_v62 = vpop.f32.mrf.mxu1 }
  0xec   : > { %2824 = vrcp.f32 %v974_v58  ;;  %v977_v63 = vadd.f32 1.0, %v2809_v61  ;;  %v2427_v0 = vmul.f32 -1.442695, %v3275_v60  ;;  %v3279_v1 = vadd.f32 %v3232_v24, %v786_v62 }
  0xed   : > { %v2811_v2 = vpop.eup %2810  ;;  %2826 = vpow2.f32 %v2424_v59  ;;  %v2635_v3 = vpop.f32.mrf.mxu1 }
  0xee   : > { %2828 = vrcp.f32 %v977_v63  ;;  %v975_v4 = vadd.f32 1.0, %v2811_v2  ;;  %v2425_v5 = vmul.f32 -1.442695, %v3279_v1  ;;  %v3283_v6 = vadd.f32 %v2635_v3, %v3232_v24 }
  0xef   : > { %v2813_v7 = vpop.eup %2812  ;;  %2830 = vpow2.f32 %v2427_v0  ;;  %v799_v10 = vpop.f32.mrf.mxu1 }
  0xf0   : > { %2832 = vrcp.f32 %v975_v4  ;;  %v980_v13 = vadd.f32 1.0, %v2813_v7  ;;  %v2430_v14 = vmul.f32 -1.442695, %v3283_v6  ;;  %v3287_v15 = vadd.f32 %v3232_v24, %v799_v10 }
  0xf1   : > { %v2815_v16 = vpop.eup %2814  ;;  %2834 = vpow2.f32 %v2425_v5  ;;  %v2636_v17 = vpop.f32.mrf.mxu1 }
  0xf2   : > { %2836 = vrcp.f32 %v980_v13  ;;  %v978_v8 = vadd.f32 1.0, %v2815_v16  ;;  %v2428_v18 = vmul.f32 -1.442695, %v3287_v15  ;;  %v3291_v9 = vadd.f32 %v2636_v17, %v3232_v24 }
  0xf3   : > { %v2817_v11 = vpop.eup %2816  ;;  %2838 = vpow2.f32 %v2430_v14  ;;  %v802_v12 = vpop.f32.mrf.mxu1 }
  0xf4   : > { %2840 = vrcp.f32 %v978_v8  ;;  %v981_v19 = vadd.f32 1.0, %v2817_v11  ;;  %v2431_v20 = vmul.f32 -1.442695, %v3291_v9  ;;  %v3295_v21 = vadd.f32 %v3232_v24, %v802_v12 }
  0xf5   : > { %v2819_v25 = vpop.eup %2818  ;;  %2842 = vpow2.f32 %v2428_v18  ;;  %v2639_v27 = vpop.f32.mrf.mxu1 }
  0xf6   : > { %2844 = vrcp.f32 %v981_v19  ;;  %v979_v28 = vadd.f32 1.0, %v2819_v25  ;;  %v2429_v30 = vmul.f32 -1.442695, %v3295_v21  ;;  %v3299_v31 = vadd.f32 %v2639_v27, %v3232_v24  ;;  %v3335_v19 = vld [vmem:[%s3810_s3 + $0x10] sm:$0x3] }
  0xf7   : > { %v2821_v33 = vpop.eup %2820  ;;  %2846 = vpow2.f32 %v2431_v20  ;;  %v815_v34 = vpop.f32.mrf.mxu1 }
  0xf8   : > { %v2823_v36 = vpop.eup %2822  ;;  %2848 = vrcp.f32 %v979_v28  ;;  %v2434_v37 = vmul.f32 -1.442695, %v3299_v31  ;;  %v3303_v39 = vadd.f32 %v3232_v24, %v815_v34  ;;  %v1072_v4 = vmul.f32 %v2821_v33, %v3235_v26 }
  0xf9   : > { %v2825_v40 = vpop.eup %2824  ;;  %v984_v42 = vadd.f32 1.0, %v2823_v36  ;;  %2850 = vpow2.f32 %v2429_v30  ;;  %v2640_v43 = vpop.f32.mrf.mxu1 }
  0xfa   : > { %v2827_v45 = vpop.eup %2826  ;;  %2852 = vpow2.f32 %v2434_v37  ;;  %v2432_v46 = vmul.f32 -1.442695, %v3303_v39  ;;  %v3307_v48 = vadd.f32 %v2640_v43, %v3232_v24  ;;  %v1070_v63 = vmul.f32 %v2825_v40, %v3239_v29 }
  0xfb   : > { %v2829_v49 = vpop.eup %2828  ;;  %2854 = vrcp.f32 %v984_v42  ;;  %v982_v51 = vadd.f32 1.0, %v2827_v45  ;;  %v818_v52 = vpop.f32.mrf.mxu1  ;;  %v1849_v29 = vsel %vm453_vm0, %v3223_v23, 0 }
  0xfc   : > { %v2831_v53 = vpop.eup %2830  ;;  %2856 = vpow2.f32 %v2432_v46  ;;  %v2435_v54 = vmul.f32 -1.442695, %v3307_v48  ;;  %v3311_v56 = vadd.f32 %v3232_v24, %v818_v52  ;;  %v1073_v58 = vmul.f32 %v2829_v49, %v3243_v32 }
  0xfd   : > { %v2833_v57 = vpop.eup %2832  ;;  %2858 = vrcp.f32 %v982_v51  ;;  %v985_v59 = vadd.f32 1.0, %v2831_v53  ;;  %v2643_v61 = vpop.f32.mrf.mxu1 }
  0xfe   : > { %v2835_v62 = vpop.eup %2834  ;;  %v1071_v0 = vmul.f32 %v2833_v57, %v3247_v35  ;;  %2860 = vpow2.f32 %v2435_v54  ;;  %v2433_v2 = vmul.f32 -1.442695, %v3311_v56  ;;  %v3319_v7 = vadd.f32 %v2643_v61, %v3232_v24 }
  0xff   : > { %v2837_v3 = vpop.eup %2836  ;;  %2862 = vrcp.f32 %v985_v59  ;;  %v983_v5 = vadd.f32 1.0, %v2835_v62  ;;  %v831_v32 = vpop.f32.mrf.mxu1  ;;  %v1103_v16 = vpack.c.bf16 %v1073_v58, %v1072_v4 }
 0x100   : > { %v2839_v10 = vpop.eup %2838  ;;  %v1102_v13 = vpack.c.bf16 %v1071_v0, %v1070_v63  ;;  %2864 = vpow2.f32 %v2433_v2  ;;  %v3322_v14 = vadd.f32 %v3232_v24, %v831_v32  ;;  %v2438_v26 = vmul.f32 -1.442695, %v3319_v7 }
 0x101   : > { %v2841_v35 = vpop.eup %2840  ;;  %2866 = vrcp.f32 %v983_v5  ;;  %v988_v17 = vadd.f32 1.0, %v2839_v10  ;;  %v2644_v8 = vpop.f32.mrf.mxu1  ;;  %v1076_v42 = vmul.f32 %v2837_v3, %v3251_v38 }
 0x102   : > { %v2843_v18 = vpop.eup %2842  ;;  %v2436_v11 = vmul.f32 -1.442695, %v3322_v14  ;;  %v3329_v12 = vadd.f32 %v2644_v8, %v3232_v24  ;;  %2695 = vmatprep.mubr.msk.bf16.mxu1 %vm440_vm1, %v1102_v13  ;;  %v1074_v43 = vmul.f32 %v2841_v35, %v3255_v41 }
 0x103   : > { %v2845_v23 = vpop.eup %2844  ;;  %2868 = vrcp.f32 %v988_v17  ;;  %v986_v20 = vadd.f32 1.0, %v2843_v18  ;;  %v834_v25 = vpop.f32.mrf.mxu1  ;;  %2696 = vmatmul.mubr.msk.bf16.vlgmr.msra.gmra.mxu1 %vm440_vm1, %v1103_v16 }
 0x104   : > { %v2847_v27 = vpop.eup %2846  ;;  %2870 = vpow2.f32 %v2438_v26  ;;  %v2439_v28 = vmul.f32 -1.442695, %v3329_v12  ;;  %v3340_v30 = vadd.f32 %v3232_v24, %v834_v25  ;;  %2714 = vmatpush3.bf16.msra.mxu1 %v1849_v29  ;;  %v1077_v34 = vmul.f32 %v2845_v23, %v3259_v44 }
 0x105   : > { %v2849_v33 = vpop.eup %2848  ;;  %2872 = vrcp.f32 %v986_v20  ;;  %v989_v36 = vadd.f32 1.0, %v2847_v27  ;;  %v2647_v37 = vpop.f32.mrf.mxu1  ;;  %2753 = vmatprep.subr.msk.bf16.mxu1 %vm453_vm0, %v3335_v19 }
 0x106   : > { %v2851_v40 = vpop.eup %2850  ;;  %v1075_v45 = vmul.f32 %v2849_v33, %v3263_v47  ;;  %2874 = vpow2.f32 %v2436_v11  ;;  %v2437_v51 = vmul.f32 -1.442695, %v3340_v30  ;;  %v3350_v44 = vadd.f32 %v2647_v37, %v3232_v24 }
 0x107   : > { %v2853_v46 = vpop.eup %2852  ;;  %2876 = vrcp.f32 %v989_v36  ;;  %v987_v49 = vadd.f32 1.0, %v2851_v40  ;;  %v847_v52 = vpop.f32.mrf.mxu1  ;;  %v1105_v58 = vpack.c.bf16 %v1077_v34, %v1076_v42 }
 0x108   : > { %v2855_v53 = vpop.eup %2854  ;;  %v1104_v54 = vpack.c.bf16 %v1075_v45, %v1074_v43  ;;  %v992_v57 = vadd.f32 1.0, %v2853_v46  ;;  %2878 = vpow2.f32 %v2439_v28  ;;  %v3353_v38 = vadd.f32 %v3232_v24, %v847_v52 }
 0x109   : > { %v2857_v41 = vpop.eup %2856  ;;  %2880 = vrcp.f32 %v987_v49  ;;  %v2442_v47 = vmul.f32 -1.442695, %v3350_v44  ;;  %v2648_v59 = vpop.f32.mrf.mxu1  ;;  %v1080_v10 = vmul.f32 %v2855_v53, %v3267_v50 }
 0x10a   : > { %v2859_v61 = vpop.eup %2858  ;;  %2882 = vrcp.f32 %v992_v57  ;;  %v990_v62 = vadd.f32 1.0, %v2857_v41  ;;  %v3357_v63 = vadd.f32 %v2648_v59, %v3232_v24  ;;  %2699 = vmatprep.mubr.msk.bf16.mxu1 %vm440_vm1, %v1104_v54  ;;  %v2440_v2 = vmul.f32 -1.442695, %v3353_v38 }
 0x10b   : > { %v2861_v0 = vpop.eup %2860  ;;  %2884 = vpow2.f32 %v2437_v51  ;;  %v850_v3 = vpop.f32.mrf.mxu1  ;;  %2700 = vmatmul.mubr.msk.bf16.gmra.mxu1 %vm440_vm1, %v1105_v58  ;;  %v1078_v18 = vmul.f32 %v2859_v61, %v3271_v55 }
 0x10c   : > { %v2863_v4 = vpop.eup %2862  ;;  %2886 = vrcp.f32 %v990_v62  ;;  %v993_v5 = vadd.f32 1.0, %v2861_v0  ;;  %v3365_v29 = vadd.f32 %v3232_v24, %v850_v3  ;;  %v2443_v26 = vmul.f32 -1.442695, %v3357_v63 }
 0x10d   : > { %v2865_v32 = vpop.eup %2864  ;;  %v1081_v13 = vmul.f32 %v2863_v4, %v3275_v60  ;;  %2888 = vpow2.f32 %v2442_v47  ;;  %v2651_v35 = vpop.f32.mrf.mxu1 }
 0x10e   : > { %v2867_v16 = vpop.eup %2866  ;;  %2890 = vrcp.f32 %v993_v5  ;;  %v991_v17 = vadd.f32 1.0, %v2865_v32  ;;  %v3369_v8 = vadd.f32 %v2651_v35, %v3232_v24  ;;  %v2441_v28 = vmul.f32 -1.442695, %v3365_v29 }
 0x10f   : > { %v3372_v11 = vpack.c.bf16 %v1081_v13, %v1080_v10  ;;  %v1079_v50 = vmul.f32 %v2867_v16, %v3279_v1  ;;  %2892 = vpow2.f32 %v2440_v2  ;;  %v863_v60 = vpop.f32.mrf.mxu1 }
 0x110   : > { %v2869_v23 = vpop.eup %2868  ;;  %2894 = vrcp.f32 %v991_v17  ;;  %v2446_v55 = vmul.f32 -1.442695, %v3369_v8  ;;  %v3381_v1 = vadd.f32 %v3232_v24, %v863_v60 }
 0x111   : > { %v2871_v20 = vpop.eup %2870  ;;  %v1259_v25 = vshrl.u32 %v3372_v11, 16  ;;  %v3376_v27 = vpack.c.bf16 %v1079_v50, %v1078_v18  ;;  %v2652_v33 = vpop.f32.mrf.mxu1  ;;  %2896 = vpow2.f32 %v2443_v26  ;;  %v1262_v42 = vshll.u32 %v3372_v11, 16 }
 0x112   : > { %v2873_v34 = vpop.eup %2872  ;;  %v996_v36 = vadd.f32 1.0, %v2871_v20  ;;  %v1084_v45 = vmul.f32 %v2869_v23, %v3283_v6  ;;  %v3389_v52 = vadd.f32 %v2652_v33, %v3232_v24  ;;  %v2444_v61 = vmul.f32 -1.442695, %v3381_v1 }
 0x113   : > { %v2875_v37 = vpop.eup %2874  ;;  %v3383_v40 = vrot.slane %v1259_v25, 7  ;;  %v1252_v43 = vshrl.u32 %v3376_v27, 16  ;;  %v866_v46 = vpop.f32.mrf.mxu1  ;;  %v1082_v6 = vmul.f32 %v2873_v34, %v3287_v15 }
 0x114   : > { %v2877_v49 = vpop.eup %2876  ;;  %2898 = vrcp.f32 %v996_v36  ;;  %v994_v51 = vadd.f32 1.0, %v2875_v37  ;;  %v3392_v53 = vadd.f32 %v3232_v24, %v866_v46 }
 0x115   : > { %v2879_v54 = vpop.eup %2878  ;;  %v1264_v57 = vor.u32 %v1262_v42, %v3383_v40  ;;  %v3395_v41 = vrot.slane %v1252_v43, 7  ;;  %v1085_v58 = vmul.f32 %v2877_v49, %v3291_v9  ;;  %2900 = vpow2.f32 %v2441_v28  ;;  %v353_v49 = vld [vmem:[#allocation2] sm:$0xf] }
 0x116   : > { %v2881_v47 = vpop.eup %2880  ;;  %2902 = vrcp.f32 %v994_v51  ;;  %v997_v59 = vadd.f32 1.0, %v2879_v54  ;;  %v2447_v9 = vmul.f32 -1.442695, %v3389_v52  ;;  %v2445_v10 = vmul.f32 -1.442695, %v3392_v53 }
 0x117   : > { %v2883_v62 = vpop.eup %2882  ;;  %v3402_v24 = vsel %vm1149_vm3, %v3395_v41, %v1264_v57  ;;  %v3404_v0 = vpack.c.bf16 %v1085_v58, %v1084_v45  ;;  %v1083_v2 = vmul.f32 %v2881_v47, %v3295_v21  ;;  %2904 = vpow2.f32 %v2446_v55 }
 0x118   : > { %v2885_v3 = vpop.eup %2884  ;;  %2906 = vrcp.f32 %v997_v59  ;;  %v1088_v18 = vmul.f32 %v2883_v62, %v3299_v31  ;;  %v3424_v31 = vld [vmem:[%s3811_s4] ss:$0 sm:$0xff] }
 0x119   : > { %v2887_v4 = vpop.eup %2886  ;;  %v1275_v15 = vshrl.u32 %v3404_v0, 16  ;;  %v3409_v5 = vpack.c.bf16 %v1083_v2, %v1082_v6  ;;  %v995_v32 = vadd.f32 1.0, %v2885_v3  ;;  %2908 = vpow2.f32 %v2444_v61  ;;  %v3440_v61 = vld [vmem:[#allocation2 + $0x4] sm:$0xf] }
 0x11a   : > { %v2889_v13 = vpop.eup %2888  ;;  %v1278_v17 = vshll.u32 %v3404_v0, 16  ;;  %v1086_v33 = vmul.f32 %v2887_v4, %v3303_v39  ;;  %v2613_v39 = vpop.f32.mrf.mxu0  ;;  %v1409_v4 = vsel %vm453_vm0, %v3218_v22, 0  ;;  %v2450_v22 = vcombine.low %v3440_v61, %v3440_v61 }
 0x11b   : > { %v2891_v35 = vpop.eup %2890  ;;  %v1277_v16 = vrot.slane %v1275_v15, 7  ;;  %v1267_v21 = vshrl.u32 %v3409_v5, 16  ;;  %2910 = vrcp.f32 %v995_v32  ;;  %v1000_v60 = vadd.f32 1.0, %v2889_v13  ;;  %v3456_v13 = vld [vmem:[%s3810_s3 + $0x4] sm:$0x3] }
 0x11c   : > { %v2893_v26 = vpop.eup %2892  ;;  %v1089_v50 = vmul.f32 %v2891_v35, %v3307_v48  ;;  %2912 = vpow2.f32 %v2447_v9  ;;  %v1270_v28 = vshll.u32 %v3409_v5, 16  ;;  %v3436_v51 = vadd.f32 %v2613_v39, %v3424_v31  ;;  %v491_v47 = vpop.f32.mrf.mxu0 }
 0x11d   : > { %v2895_v23 = vpop.eup %2894  ;;  %v1280_v20 = vor.u32 %v1278_v17, %v1277_v16  ;;  %v1269_v25 = vrot.slane %v1267_v21, 7  ;;  %2914 = vpow2.f32 %v2445_v10  ;;  %v998_v37 = vadd.f32 1.0, %v2893_v26 }
 0x11e   : > { %v3418_v34 = vpack.c.bf16 %v1089_v50, %v1088_v18  ;;  %v1087_v36 = vmul.f32 %v2895_v23, %v3311_v56  ;;  %v2897_v48 = vpop.eup %2896  ;;  %2916 = vrcp.f32 %v1000_v60  ;;  %v2377_v62 = vmul.f32 -1.442695, %v3436_v51  ;;  %v2614_v15 = vpop.f32.mrf.mxu0 }
 0x11f   : > { %v1272_v55 = vor.u32 %v1270_v28, %v1269_v25  ;;  %v3427_v42 = vsel %vm1149_vm3, %v1269_v25, %v1280_v20  ;;  %v1001_v45 = vadd.f32 1.0, %v2897_v48  ;;  %v3460_v16 = vadd.f32 %v2614_v15, %v3424_v31 }
 0x120   : > { %v3429_v43 = vpack.c.bf16 %v1087_v36, %v1086_v33  ;;  %v1228_v57 = vrot.slane %v3418_v34, 4  ;;  %v494_v21 = vpop.f32.mrf.mxu0 }
 0x121   : > { %v2899_v46 = vpop.eup %2898  ;;  %v3433_v56 = vsel %vm1149_vm3, %v3383_v40, %v1272_v55  ;;  %2918 = vrcp.f32 %v1001_v45  ;;  %v3444_v40 = vadd.f32 %v3424_v31, %v491_v47  ;;  %v2378_v50 = vmul.f32 -1.442695, %v3460_v16 }
 0x122   : > { %v2901_v54 = vpop.eup %2900  ;;  %v1227_v58 = vrot.slane %v3429_v43, 4  ;;  %2920 = vrcp.f32 %v998_v37  ;;  %v1092_v18 = vmul.f32 %v2899_v46, %v3319_v7  ;;  %v3469_v60 = vadd.f32 %v3424_v31, %v494_v21  ;;  %v2617_v48 = vpop.f32.mrf.mxu0 }
 0x123   : > { %v2903_v6 = vpop.eup %2902  ;;  %v999_v59 = vadd.f32 1.0, %v2901_v54  ;;  %v2375_v35 = vmul.f32 -1.442695, %v3444_v40  ;;  %v3480_v45 = vadd.f32 %v2617_v48, %v3424_v31 }
 0x124   : > { %v2905_v2 = vpop.eup %2904  ;;  %v1237_v3 = vsel %vm1226_vm4, %v353_v49, %v1227_v58  ;;  %v1229_v9 = vsel %vm1226_vm4, %v1227_v58, %v1228_v57  ;;  %v2376_v36 = vmul.f32 -1.442695, %v3469_v60  ;;  %v507_v49 = vpop.f32.mrf.mxu0 }
 0x125   : > { %v2907_v32 = vpop.eup %2906  ;;  %2922 = vrcp.f32 %v999_v59  ;;  %v1004_v10 = vadd.f32 1.0, %v2905_v2  ;;  %2655 = vmatprep.mubr.msk.bf16.mxu0 %vm440_vm1, %v1237_v3  ;;  %v2381_v2 = vmul.f32 -1.442695, %v3480_v45 }
 0x126   : > { %v1093_v17 = vmul.f32 %v2907_v32, %v3329_v12  ;;  %2656 = vmatmul.mubr.msk.bf16.vlgmr.msra.gmra.mxu0 %vm440_vm1, %v1229_v9  ;;  %2924 = vpow2.f32 %v2377_v62  ;;  %v2909_v26 = vpop.eup %2908  ;;  %v1090_v12 = vmul.f32 %v2903_v6, %v3322_v14  ;;  %v1141_v14 = vshrl.u32 %v2450_v22, 16  ;;  %v2618_v6 = vpop.f32.mrf.mxu0 }
 0x127   : > { %2926 = vrcp.f32 %v1004_v10  ;;  %2664 = vmatpush3.bf16.msra.mxu0 %v1409_v4  ;;  %v1002_v25 = vadd.f32 1.0, %v2909_v26  ;;  %v1144_v62 = vshll.u32 %v2450_v22, 16  ;;  %v3491_v3 = vadd.f32 %v2618_v6, %v3424_v31 }
 0x128   : > { %v2911_v23 = vpop.eup %2910  ;;  %v2524_v20 = vpack.c.bf16 %v1093_v17, %v1093_v17  ;;  %2747 = vmatprep.subr.msk.bf16.mxu0 %vm453_vm0, %v3456_v13  ;;  %2928 = vpow2.f32 %v2375_v35  ;;  %v3474_v33 = vpack.c.bf16 %v1093_v17, %v1092_v18  ;;  %v1143_v59 = vrot.slane %v1141_v14, 7  ;;  %v510_v10 = vpop.f32.mrf.mxu0 }
 0x129   : > { %v2913_v28 = vpop.eup %2912  ;;  %v1091_v7 = vmul.f32 %v2911_v23, %v3340_v30  ;;  %2930 = vpow2.f32 %v2378_v50  ;;  %v3485_v30 = vadd.f32 %v3424_v31, %v507_v49  ;;  %v2382_v21 = vmul.f32 -1.442695, %v3491_v3 }
 0x12a   : > { %v2915_v55 = vpop.eup %2914  ;;  %2932 = vrcp.f32 %v1002_v25  ;;  %v1005_v37 = vadd.f32 1.0, %v2913_v28  ;;  %1123 = vst.msk [vmem:[#allocation2] sm:$0xf] %vm350_vm2, %v2524_v20  ;;  %v1232_v58 = vrot.slane %v3474_v33, 4  ;;  %v3503_v26 = vadd.f32 %v3424_v31, %v510_v10 }
 0x12b   : > { %v3482_v39 = vpack.c.bf16 %v1091_v7, %v1090_v12  ;;  %v1003_v46 = vadd.f32 1.0, %v2915_v55  ;;  %2934 = vpow2.f32 %v2376_v36  ;;  %v2917_v54 = vpop.eup %2916  ;;  %v2379_v32 = vmul.f32 -1.442695, %v3485_v30  ;;  %v3516_v28 = vld [vmem:[%s3810_s3 + $0x4] ss:$0 sps:$4 sm:$0xcc]  }
 0x12c   : > { %2936 = vrcp.f32 %v1005_v37  ;;  %v1096_v17 = vmul.f32 %v2917_v54, %v3350_v44  ;;  %v1146_v50 = vor.u32 %v1144_v62, %v1143_v59  ;;  %v2380_v23 = vmul.f32 -1.442695, %v3503_v26 }
 0x12d   : > { %v1230_v47 = vrot.slane %v3482_v39, 4  ;;  %2938 = vrcp.f32 %v1003_v46 }
 0x12e   : > { %v2919_v9 = vpop.eup %2918  ;;  %2940 = vpow2.f32 %v2381_v2  ;;  %v1151_v46 = vsel %vm3522_vm7, 0, %v1146_v50 }
 0x12f   : > { %v1231_v4 = vsel %vm1226_vm4, %v1228_v57, %v1230_v47  ;;  %v1233_v15 = vsel %vm1226_vm4, %v1230_v47, %v1232_v58  ;;  %v2921_v35 = vpop.eup %2920  ;;  %v1097_v22 = vmul.f32 %v2919_v9, %v3357_v63  ;;  %2942 = vpow2.f32 %v2379_v32 }
 0x130   : > { %2659 = vmatprep.mubr.msk.bf16.mxu0 %vm440_vm1, %v1231_v4  ;;  %v1094_v63 = vmul.f32 %v2921_v35, %v3353_v38  ;;  %2944 = vpow2.f32 %v2382_v21  ;;  %v1489_v47 = vsel %vm453_vm0, %v3456_v13, 0  ;;  %v2027_v9 = vsel %vm453_vm0, %v3335_v19, 0 }
 0x131   : > { %2660 = vmatmul.mubr.msk.bf16.gmra.mxu0 %vm440_vm1, %v1233_v15  ;;  %v3506_v18 = vpack.c.bf16 %v1097_v22, %v1096_v17  ;;  %2946 = vpow2.f32 %v2380_v23  ;;  %v1568_v4 = vrot.slane %v3516_v28, 2 }
 0x132   : > { %v2923_v57 = vpop.eup %2922 }
 0x133   : > { %v2925_v44 = vpop.eup %2924  ;;  %v1095_v12 = vmul.f32 %v2923_v57, %v3365_v29  ;;  %v1162_v31 = vshrl.u32 %v3506_v18, 16  ;;  %v1165_v25 = vshll.u32 %v3506_v18, 16 }
 0x134   : > { %v2927_v20 = vpop.eup %2926  ;;  %v548_v29 = vadd.f32 1.0, %v2925_v44 }
 0x135   : > { %v2929_v7 = vpop.eup %2928  ;;  %v3518_v36 = vpack.c.bf16 %v1095_v12, %v1094_v63  ;;  %v1164_v55 = vrot.slane %v1162_v31, 3  ;;  %v1167_v37 = vrot.slane %v1165_v25, 4  ;;  %v3526_v14 = vrot.slane %v1162_v31, 7  ;;  %v3549_v63 = vld [vmem:[%s3814_s7] sm:$0xff]   ;;  %v3555_v12 = vld [vmem:[%s3814_s7 + $0x8] sm:$0xff]  }
 0x136   : > { %v2931_v48 = vpop.eup %2930  ;;  %v546_v6 = vadd.f32 1.0, %v2929_v7  ;;  %v1100_v2 = vmul.f32 %v2927_v20, %v3369_v8  ;;  %2948 = vrcp.f32 %v548_v29 }
 0x137   : > { %v2933_v49 = vpop.eup %2932  ;;  %v1154_v54 = vshrl.u32 %v3518_v36, 16  ;;  %v1157_v58 = vshll.u32 %v3518_v36, 16  ;;  %v1294_v62 = vor.u32 %v3526_v14, %v1165_v25  ;;  %v1168_v22 = vor.u32 %v1167_v37, %v1164_v55 }
 0x138   : > { %v2935_v59 = vpop.eup %2934  ;;  %v1098_v13 = vmul.f32 %v2933_v49, %v3381_v1  ;;  %v549_v8 = vadd.f32 1.0, %v2931_v48  ;;  %2950 = vrcp.f32 %v546_v6 }
 0x139   : > { %v2937_v15 = vpop.eup %2936  ;;  %v1156_v32 = vrot.slane %v1154_v54, 3  ;;  %v1159_v10 = vrot.slane %v1157_v58, 4  ;;  %v1291_v35 = vrot.slane %v1154_v54, 7 }
 0x13a   : > { %v2939_v17 = vpop.eup %2938  ;;  %v1101_v21 = vmul.f32 %v2937_v15, %v3389_v52  ;;  %v547_v52 = vadd.f32 1.0, %v2935_v59  ;;  %2952 = vrcp.f32 %v549_v8 }
 0x13b   : > { %v1099_v57 = vmul.f32 %v2939_v17, %v3392_v53  ;;  %v1160_v19 = vor.u32 %v1159_v10, %v1156_v32  ;;  %v1292_v50 = vor.u32 %v1291_v35, %v1157_v58  ;;  %v1295_v1 = vsel %vm1149_vm3, %v1291_v35, %v1294_v62  ;;  %v2941_v37 = vpop.eup %2940 }
 0x13c   : > { %v3544_v23 = vpack.c.bf16 %v1101_v21, %v1100_v2  ;;  %v2525_v44 = vpack.c.bf16 %v1101_v21, %v1101_v21  ;;  %v1308_v58 = vmul.bf16 %v3555_v12, %v1295_v1  ;;  %v2943_v6 = vpop.eup %2942  ;;  %2954 = vrcp.f32 %v547_v52 }
 0x13d   : > { %v3557_v53 = vpack.c.bf16 %v1099_v57, %v1098_v13  ;;  %v1169_v20 = vsel %vm1152_vm6, %v1160_v19, %v1168_v22  ;;  %v1194_v31 = vsel %vm1193_vm9, %v1151_v46, %v1160_v19  ;;  %v1306_v25 = vsel %vm3522_vm7, 0, %v1292_v50  ;;  %v2945_v15 = vpop.eup %2944 }
 0x13e   : > { %1128 = vst.msk [vmem:[#allocation2 + $0x4] sm:$0xf] %vm350_vm2, %v2525_v44  ;;  %v1180_v7 = vshrl.u32 %v3544_v23, 16  ;;  %v1183_v29 = vshll.u32 %v3544_v23, 16  ;;  %v1219_v48 = vmul.bf16 %v3549_v63, %v1194_v31  ;;  %v1307_v55 = vmul.bf16 %v3549_v63, %v1306_v25  ;;  %v2947_v17 = vpop.eup %2946  ;;  %v3581_v44 = vld [vmem:[%s3814_s7 + $0x10] sm:$0xff]  }
 0x13f   : > { %v1171_v49 = vshrl.u32 %v3557_v53, 16  ;;  %v1174_v54 = vshll.u32 %v3557_v53, 16  ;;  %v1220_v46 = vmul.bf16 %v3555_v12, %v1169_v20  ;;  %v552_v8 = vadd.f32 1.0, %v2941_v37 }
 0x140   : > { %v1182_v59 = vrot.slane %v1180_v7, 3  ;;  %v1185_v62 = vrot.slane %v1183_v29, 4  ;;  %v1299_v2 = vrot.slane %v1180_v7, 7  ;;  %2665 = vmatprep.mubr.msk.bf16.mxu0 %vm440_vm1, %v1219_v48  ;;  %2715 = vmatprep.mubr.msk.bf16.mxu1 %vm440_vm1, %v1307_v55  ;;  %v550_v50 = vadd.f32 1.0, %v2943_v6 }
 0x141   : > { %v1173_v32 = vrot.slane %v1171_v49, 3  ;;  %v1176_v10 = vrot.slane %v1174_v54, 4  ;;  %v1296_v35 = vrot.slane %v1171_v49, 7  ;;  %2666 = vmatmul.mubr.msk.bf16.vlgmr.msra.gmra.mxu0 %vm440_vm1, %v1220_v46  ;;  %2716 = vmatmul.mubr.msk.bf16.vlgmr.msra.gmra.mxu1 %vm440_vm1, %v1308_v58  ;;  %v1241_v1 = vrot.slane %v3518_v36, 4 }
 0x142   : > { %2674 = vmatpush3.bf16.msra.mxu0 %v1489_v47  ;;  %v1186_v13 = vor.u32 %v1185_v62, %v1182_v59  ;;  %v1300_v21 = vor.u32 %v1299_v2, %v1183_v29  ;;  %2734 = vmatpush3.bf16.msra.mxu1 %v2027_v9  ;;  %v3586_v47 = vld [vmem:[%s3814_s7 + $0x18] sm:$0xff]   ;;  %v553_v52 = vadd.f32 1.0, %v2945_v15  ;;  %v551_v7 = vadd.f32 1.0, %v2947_v17 }
 0x143   : > { %v1177_v57 = vor.u32 %v1176_v10, %v1173_v32  ;;  %v1297_v19 = vor.u32 %v1296_v35, %v1174_v54  ;;  %2748 = vmatprep.subr.msk.bf16.mxu0 %vm453_vm0, %v1568_v4  ;;  %v2949_v29 = vpop.eup %2948  ;;  %2956 = vrcp.f32 %v552_v8  ;;  %v1255_v46 = vshll.u32 %v3376_v27, 16 }
 0x144   : > { %v1301_v9 = vsel %vm1149_vm3, %v1296_v35, %v1300_v21  ;;  %2958 = vrcp.f32 %v550_v50  ;;  %v1242_v6 = vrot.slane %v3506_v18, 4  ;;  %v1244_v59 = vrot.slane %v3557_v53, 4 }
 0x145   : > { %v1178_v20 = vsel %vm1152_vm6, %v1168_v22, %v1177_v57  ;;  %v1298_v31 = vsel %vm1149_vm3, %v3526_v14, %v1297_v19  ;;  %v1187_v25 = vsel %vm1152_vm6, %v1177_v57, %v1186_v13  ;;  %v1310_v49 = vmul.bf16 %v3586_v47, %v1301_v9  ;;  %v2951_v54 = vpop.eup %2950  ;;  %v2802_v22 = vld [vmem:[%s3810_s3 + $0x8] ss:$0 sps:$4 sm:$0xcc]  }
 0x146   : > { %v1221_v48 = vmul.bf16 %v3581_v44, %v1178_v20  ;;  %v1309_v55 = vmul.bf16 %v3581_v44, %v1298_v31  ;;  %v1222_v37 = vmul.bf16 %v3586_v47, %v1187_v25  ;;  %2960 = vrcp.f32 %v553_v52 }
 0x147   : > { %v1250_v14 = vsel %vm1226_vm4, %v3440_v61, %v1241_v1  ;;  %2962 = vrcp.f32 %v551_v7  ;;  %v2953_v58 = vpop.eup %2952  ;;  %v572_v62 = vmul.f32 %v2949_v29, %v3436_v51  ;;  %v570_v61 = vmul.f32 %v2951_v54, %v3444_v40 }
 0x148   : > { %2669 = vmatprep.mubr.msk.bf16.mxu0 %vm440_vm1, %v1221_v48  ;;  %2719 = vmatprep.mubr.msk.bf16.mxu1 %vm440_vm1, %v1309_v55  ;;  %v1243_v15 = vsel %vm1226_vm4, %v1241_v1, %v1242_v6  ;;  %v1257_v32 = vor.u32 %v1255_v46, %v3395_v41  ;;  %v1750_v10 = vrot.slane %v2802_v22, 2  ;;  %v573_v35 = vmul.f32 %v2953_v58, %v3460_v16 }
 0x149   : > { %2670 = vmatmul.mubr.msk.bf16.gmra.mxu0 %vm440_vm1, %v1222_v37  ;;  %2720 = vmatmul.mubr.msk.bf16.gmra.mxu1 %vm440_vm1, %v1310_v49  ;;  %v2955_v2 = vpop.eup %2954  ;;  %v2536_v13 = vpack.c.bf16 %v572_v62, %v572_v62  ;;  %v2534_v21 = vpack.c.bf16 %v570_v61, %v570_v61  ;;  %v1245_v51 = vsel %vm1226_vm4, %v1242_v6, %v1244_v59 }
 0x14a   : > { %2675 = vmatprep.mubr.msk.bf16.mxu0 %vm440_vm1, %v1250_v14  ;;  %2735 = vmatprep.mubr.msk.bf16.mxu1 %vm440_vm1, %v3518_v36  ;;  %v1582_v36 = vsel %vm453_vm0, %v1568_v4, 0  ;;  %v571_v17 = vmul.f32 %v2955_v2, %v3469_v60  ;;  %v1286_v16 = vsel %vm3522_vm7, 0, %v1257_v32  ;;  %v2537_v60 = vpack.c.bf16 %v573_v35, %v573_v35 }
 0x14b   : > { %2241 = vrot.lane.b32.xlu1 %v2536_v13, %s3021_s9  ;;  %2237 = vrot.lane.b32.xlu0 %v2534_v21, %s3021_s9  ;;  %v1246_v4 = vrot.slane %v3544_v23, 4  ;;  %v1290_v31 = vmul.bf16 %v3586_v47, %v3427_v42 }
 0x14c   : > { %v2535_v28 = vpack.c.bf16 %v571_v17, %v571_v17 }
 0x14d   : > { %v1247_v8 = vsel %vm1226_vm4, %v1244_v59, %v1246_v4 }
 0x14f   : > { %2243 = vrot.lane.b32.xlu1 %v2537_v60, %s3021_s9  ;;  %2239 = vrot.lane.b32.xlu0 %v2535_v28, %s3021_s9 }
 0x150   : > { %v2957_v40 = vpop.eup %2956 }
 0x151   : > { %2676 = vmatmul.mubr.msk.bf16.vlgmr.msra.gmra.mxu0 %vm440_vm1, %v1243_v15  ;;  %2736 = vmatmul.mubr.msk.bf16.vlgmr.msra.gmra.mxu1 %vm440_vm1, %v3506_v18  ;;  %v2959_v41 = vpop.eup %2958  ;;  %v576_v38 = vmul.f32 %v2957_v40, %v3480_v45  ;;  %v1288_v45 = vmul.bf16 %v3555_v12, %v3402_v24 }
 0x152   : > { %2684 = vmatpush3.bf16.msra.mxu0 %v1582_v36  ;;  %2679 = vmatprep.mubr.msk.bf16.mxu0 %vm440_vm1, %v1245_v51  ;;  %v574_v57 = vmul.f32 %v2959_v41, %v3485_v30 }
 0x153   : > { %2739 = vmatprep.mubr.msk.bf16.mxu1 %vm440_vm1, %v3557_v53  ;;  %2750 = vmatprep.subr.msk.bf16.mxu0 %vm453_vm0, %v1750_v10  ;;  %v2961_v18 = vpop.eup %2960  ;;  %v1287_v53 = vmul.bf16 %v3549_v63, %v1286_v16  ;;  %v2803_v63 = vld [vmem:[%s3810_s3 + $0xc] ss:$0 sps:$4 sm:$0xcc]  }
 0x154   : > { %v2963_v19 = vpop.eup %2962  ;;  %v2538_v9 = vpack.c.bf16 %v574_v57, %v574_v57  ;;  %v577_v1 = vmul.f32 %v2961_v18, %v3491_v3  ;;  %v1760_v3 = vsel %vm453_vm0, %v1750_v10, 0  ;;  %v1928_v20 = vrot.slane %v2803_v63, 2 }
 0x155   : > { %v575_v50 = vmul.f32 %v2963_v19, %v3503_v26  ;;  %v2540_v26 = vpack.c.bf16 %v576_v38, %v576_v38 }
 0x156   : > { %v2541_v52 = vpack.c.bf16 %v577_v1, %v577_v1  ;;  %2245 = vrot.lane.b32.xlu0 %v2538_v9, %s3021_s9  ;;  %v1942_v24 = vsel %vm453_vm0, %v1928_v20, 0 }
 0x157   : > { %v2539_v30 = vpack.c.bf16 %v575_v50, %v575_v50 }
 0x159   : > { %2680 = vmatmul.mubr.msk.bf16.gmra.mxu0 %vm440_vm1, %v1247_v8  ;;  %2740 = vmatmul.mubr.msk.bf16.gmra.mxu1 %vm440_vm1, %v3544_v23  ;;  %v1289_v23 = vmul.bf16 %v3581_v44, %v3433_v56 }
 0x15a   : > { %2685 = vmatprep.mubr.msk.bf16.mxu0 %vm440_vm1, %v1287_v53  ;;  %2247 = vrot.lane.b32.xlu1 %v2539_v30, %s3021_s9 }
 0x15b   : > { %2249 = vrot.lane.b32.xlu0 %v2540_v26, %s3021_s9 }
 0x15e   : > { %2251 = vrot.lane.b32.xlu1 %v2541_v52, %s3021_s9 }
 0x161   : > { %2686 = vmatmul.mubr.msk.bf16.vlgmr.msra.gmra.mxu0 %vm440_vm1, %v1288_v45 }
 0x162   : > { %2704 = vmatpush3.bf16.msra.mxu0 %v1760_v3  ;;  %2689 = vmatprep.mubr.msk.bf16.mxu0 %vm440_vm1, %v1289_v23 }
 0x163   : > { %2752 = vmatprep.subr.msk.bf16.mxu0 %vm453_vm0, %v1928_v20 }
 0x169   : > { %2690 = vmatmul.mubr.msk.bf16.gmra.mxu0 %vm440_vm1, %v1290_v31 }
 0x16a   : > { %2705 = vmatprep.mubr.msk.bf16.mxu0 %vm440_vm1, %v3376_v27 }
 0x171   : > { %2706 = vmatmul.mubr.msk.bf16.vlgmr.msra.gmra.mxu0 %vm440_vm1, %v3372_v11 }
 0x172   : > { %2724 = vmatpush3.bf16.msra.mxu0 %v1942_v24  ;;  %2709 = vmatprep.mubr.msk.bf16.mxu0 %vm440_vm1, %v3409_v5 }
 0x179   : > { %2710 = vmatmul.mubr.msk.bf16.gmra.mxu0 %vm440_vm1, %v3404_v0 }
 0x17a   : > { %2725 = vmatprep.mubr.msk.bf16.mxu0 %vm440_vm1, %v3429_v43 }
 0x181   : > { %2726 = vmatmul.mubr.msk.bf16.vlgmr.msra.gmra.mxu0 %vm440_vm1, %v3418_v34 }
 0x182   : > { %2729 = vmatprep.mubr.msk.bf16.mxu0 %vm440_vm1, %v3482_v39 }
 0x189   : > { %2730 = vmatmul.mubr.msk.bf16.gmra.mxu0 %vm440_vm1, %v3474_v33 }
 0x1c3   : > { %v2697_v12 = vpop.f32.mrf.mxu1 }
 0x1c5   : > { %v3676_v44 = vpop.f32.mrf.mxu1 }
 0x1c7   : > { %v3680_v47 = vpop.f32.mrf.mxu1 }
 0x1c9   : > { %v3684_v25 = vpop.f32.mrf.mxu1 }
 0x1cb   : > { %v3686_v29 = vpop.f32.mrf.mxu1 }
 0x1cd   : > { %v3688_v37 = vpop.f32.mrf.mxu1 }
 0x1cf   : > { %v3690_v14 = vpop.f32.mrf.mxu1 }
 0x1d1   : > { %v3692_v58 = vpop.f32.mrf.mxu1 }
 0x1e6   : > { %v2657_v11 = vpop.f32.mrf.mxu0 }
 0x1e8   : > { %v1365_v27 = vpop.f32.mrf.mxu0 }
 0x1ea   : > { %v2658_v42 = vpop.f32.mrf.mxu0 }
 0x1ec   : > { %v1368_v56 = vpop.f32.mrf.mxu0 }
 0x1f1   : > { %v3674_v5 = vpop.f32.mrf.mxu0 }
 0x1f3   : > { %v1381_v0 = vpop.f32.mrf.mxu0 }
 0x1f5   : > { %v3678_v43 = vpop.f32.mrf.mxu0 }
 0x1f7   : > { %v3682_v34 = vpop.f32.mrf.mxu0 }
 0x201   : > { %v2667_v39 = vpop.f32.mrf.mxu0  ;;  %v2717_v59 = vpop.f32.mrf.mxu1 }
 0x202   : > { %v1454_v53 = vadd.f32 %v2667_v39, %v2657_v11 }
 0x203   : > { %v1445_v33 = vpop.f32.mrf.mxu0  ;;  %v3694_v2 = vpop.f32.mrf.mxu1 }
 0x204   : > { %v1446_v38 = vadd.f32 %v1445_v33, %v1365_v27 }
 0x205   : > { %v2668_v7 = vpop.f32.mrf.mxu0  ;;  %v3696_v32 = vpop.f32.mrf.mxu1 }
 0x206   : > { %v1457_v63 = vadd.f32 %v2668_v7, %v2658_v42 }
 0x207   : > { %v1448_v48 = vpop.f32.mrf.mxu0  ;;  %v3698_v17 = vpop.f32.mrf.mxu1 }
 0x208   : > { %v1449_v3 = vadd.f32 %v1448_v48, %v1368_v56 }
 0x209   : > { %v2671_v55 = vpop.f32.mrf.mxu0  ;;  %v3700_v51 = vpop.f32.mrf.mxu1 }
 0x20a   : > { %3818 = vst [vmem:[#allocation3_spill] sm:$0xff] %v3700_v51 }
 0x20b   : > { %v1461_v49 = vpop.f32.mrf.mxu0  ;;  %v3702_v16 = vpop.f32.mrf.mxu1 }
 0x20c   : > { %3819 = vst [vmem:[#allocation4_spill] sm:$0xff] %v3702_v16  ;;  %v1462_v11 = vadd.f32 %v1461_v49, %v1381_v0 }
 0x20d   : > { %v2672_v54 = vpop.f32.mrf.mxu0  ;;  %v3704_v18 = vpop.f32.mrf.mxu1 }
 0x20e   : > { %3820 = vst [vmem:[#allocation5_spill] sm:$0xff] %v3704_v18  ;;  %v1473_v42 = vadd.f32 %v2672_v54, %v3678_v43 }
 0x20f   : > { %v1464_v22 = vpop.f32.mrf.mxu0  ;;  %v3706_v19 = vpop.f32.mrf.mxu1 }
 0x210   : > { %3821 = vst [vmem:[#allocation6_spill] sm:$0xff] %v3706_v19  ;;  %v1470_v19 = vadd.f32 %v2671_v55, %v3674_v5 }
 0x211   : > { %v2677_v46 = vpop.f32.mrf.mxu0  ;;  %v2737_v1 = vpop.f32.mrf.mxu1 }
 0x212   : > { %v1558_v9 = vadd.f32 %v2677_v46, %v1454_v53 }
 0x213   : > { %v1525_v6 = vpop.f32.mrf.mxu0  ;;  %v2063_v31 = vpop.f32.mrf.mxu1 }
 0x214   : > { %v1556_v26 = vadd.f32 %v1525_v6, %v1446_v38 }
 0x215   : > { %v2678_v62 = vpop.f32.mrf.mxu0  ;;  %v2738_v7 = vpop.f32.mrf.mxu1 }
 0x216   : > { %v1559_v20 = vadd.f32 %v2678_v62, %v1457_v63 }
 0x217   : > { %v1528_v61 = vpop.f32.mrf.mxu0 }
 0x218   : > { %v1557_v18 = vadd.f32 %v1528_v61, %v1449_v3  ;;  %v1465_v61 = vadd.f32 %v1464_v22, %v3682_v34  ;;  %v2495_v22 = vld [vmem:[%s3813_s6] ss:$0 sm:$0xff] }
 0x219   : > { %v2681_v15 = vpop.f32.mrf.mxu0 }
 0x21a   : > { %v1562_v6 = vadd.f32 %v2681_v15, %v1470_v19 }
 0x21b   : > { %v1541_v36 = vpop.f32.mrf.mxu0 }
 0x21c   : > { %v1560_v56 = vadd.f32 %v1541_v36, %v1462_v11 }
 0x21d   : > { %v2682_v10 = vpop.f32.mrf.mxu0 }
 0x21f   : > { %v1544_v35 = vpop.f32.mrf.mxu0 }
 0x221   : > { %v2687_v13 = vpop.f32.mrf.mxu0 }
 0x222   : > { %v1651_v52 = vadd.f32 %v2687_v13, %v1558_v9 }
 0x223   : > { %v1618_v21 = vpop.f32.mrf.mxu0 }
 0x224   : > { %v1649_v23 = vadd.f32 %v1618_v21, %v1556_v26  ;;  %v1740_v51 = vadd.f32 %v2697_v12, %v1651_v52  ;;  %v1563_v12 = vadd.f32 %v2682_v10, %v1473_v42 }
 0x225   : > { %v2688_v40 = vpop.f32.mrf.mxu0 }
 0x226   : > { %v1652_v16 = vadd.f32 %v2688_v40, %v1559_v20  ;;  %v1738_v46 = vadd.f32 %v3676_v44, %v1649_v23  ;;  %v2066_v44 = vpop.f32.mrf.mxu1  ;;  %v1561_v40 = vadd.f32 %v1544_v35, %v1465_v61 }
 0x227   : > { %v1621_v41 = vpop.f32.mrf.mxu0 }
 0x228   : > { %v1650_v27 = vadd.f32 %v1621_v41, %v1557_v18  ;;  %v1741_v13 = vadd.f32 %v3680_v47, %v1652_v16  ;;  %v2741_v16 = vpop.f32.mrf.mxu1 }
 0x229   : > { %v2691_v60 = vpop.f32.mrf.mxu0 }
 0x22a   : > { %v1655_v21 = vadd.f32 %v2691_v60, %v1562_v6  ;;  %v1739_v49 = vadd.f32 %v3684_v25, %v1650_v27  ;;  %v3825_v6 = vld [vmem:[#allocation6_spill] sm:$0xff] }
 0x22b   : > { %v1634_v28 = vpop.f32.mrf.mxu0 }
 0x22c   : > { %v1653_v5 = vadd.f32 %v1634_v28, %v1560_v56  ;;  %v1744_v47 = vadd.f32 %v3686_v29, %v1655_v21 }
 0x22d   : > { %v2692_v4 = vpop.f32.mrf.mxu0 }
 0x22e   : > { %v1656_v43 = vadd.f32 %v2692_v4, %v1563_v12  ;;  %v1742_v34 = vadd.f32 %v3688_v37, %v1653_v5 }
 0x22f   : > { %v1637_v57 = vpop.f32.mrf.mxu0 }
 0x230   : > { %v1654_v18 = vadd.f32 %v1637_v57, %v1561_v40  ;;  %v1745_v4 = vadd.f32 %v3690_v14, %v1656_v43  ;;  %v3822_v14 = vld [vmem:[#allocation3_spill] sm:$0xff] }
 0x231   : > { %v2707_v8 = vpop.f32.mrf.mxu0 }
 0x232   : > { %v1829_v33 = vadd.f32 %v2707_v8, %v1740_v51  ;;  %v1743_v53 = vadd.f32 %v3692_v58, %v1654_v18 }
 0x233   : > { %v1796_v50 = vpop.f32.mrf.mxu0 }
 0x234   : > { %v1827_v62 = vadd.f32 %v1796_v50, %v1738_v46  ;;  %v1918_v51 = vadd.f32 %v2717_v59, %v1829_v33 }
 0x235   : > { %v2708_v30 = vpop.f32.mrf.mxu0 }
 0x236   : > { %v1830_v55 = vadd.f32 %v2708_v30, %v1741_v13  ;;  %v1916_v41 = vadd.f32 %v3694_v2, %v1827_v62  ;;  %v2079_v30 = vpop.f32.mrf.mxu1 }
 0x237   : > { %v1799_v45 = vpop.f32.mrf.mxu0 }
 0x238   : > { %v1828_v15 = vadd.f32 %v1799_v45, %v1739_v49  ;;  %v1919_v35 = vadd.f32 %v3696_v32, %v1830_v55  ;;  %v3823_v45 = vld [vmem:[#allocation4_spill] sm:$0xff]  ;;  %v2742_v46 = vpop.f32.mrf.mxu1 }
 0x239   : > { %v2711_v24 = vpop.f32.mrf.mxu0 }
 0x23a   : > { %v1833_v60 = vadd.f32 %v2711_v24, %v1744_v47  ;;  %v1917_v37 = vadd.f32 %v3698_v17, %v1828_v15  ;;  %v3824_v24 = vld [vmem:[#allocation5_spill] sm:$0xff]  ;;  %v2082_v55 = vpop.f32.mrf.mxu1 }
 0x23b   : > { %v1812_v39 = vpop.f32.mrf.mxu0 }
 0x23c   : > { %v1831_v28 = vadd.f32 %v1812_v39, %v1742_v34  ;;  %v1922_v26 = vadd.f32 %v3822_v14, %v1833_v60 }
 0x23d   : > { %v2712_v48 = vpop.f32.mrf.mxu0 }
 0x23e   : > { %v1834_v8 = vadd.f32 %v2712_v48, %v1745_v4  ;;  %v1920_v3 = vadd.f32 %v3823_v45, %v1831_v28  ;;  %v2238_v4 = vpop.permute.xlu0 %2237 }
 0x23f   : > { %v1815_v0 = vpop.f32.mrf.mxu0 }
 0x240   : > { %v1832_v63 = vadd.f32 %v1815_v0, %v1743_v53  ;;  %v1923_v11 = vadd.f32 %v3824_v24, %v1834_v8 }
 0x241   : > { %v2727_v54 = vpop.f32.mrf.mxu0 }
 0x242   : > { %v2011_v36 = vadd.f32 %v2727_v54, %v1918_v51  ;;  %v1921_v56 = vadd.f32 %v3825_v6, %v1832_v63 }
 0x243   : > { %v1978_v10 = vpop.f32.mrf.mxu0 }
 0x244   : > { %v2096_v25 = vadd.f32 %v2737_v1, %v2011_v36  ;;  %v2009_v59 = vadd.f32 %v1978_v10, %v1916_v41 }
 0x245   : > { %v2728_v2 = vpop.f32.mrf.mxu0 }
 0x246   : > { %v3722_v57 = vadd.f32 %v2495_v22, %v2096_v25  ;;  %v2094_v29 = vadd.f32 %v2063_v31, %v2009_v59  ;;  %v2012_v19 = vadd.f32 %v2728_v2, %v1919_v35 }
 0x247   : > { %v1981_v50 = vpop.f32.mrf.mxu0 }
 0x248   : > { %v2498_v38 = vmul.f32 -1.442695, %v3722_v57  ;;  %v3727_v9 = vadd.f32 %v2495_v22, %v2094_v29  ;;  %v2097_v32 = vadd.f32 %v2738_v7, %v2012_v19  ;;  %v2010_v1 = vadd.f32 %v1981_v50, %v1917_v37  ;;  %v2242_v19 = vpop.permute.xlu1 %2241 }
 0x249   : > { %v2731_v52 = vpop.f32.mrf.mxu0 }
 0x24a   : > { %2964 = vpow2.f32 %v2498_v38  ;;  %v2496_v17 = vmul.f32 -1.442695, %v3727_v9  ;;  %v3732_v20 = vadd.f32 %v2495_v22, %v2097_v32  ;;  %v2095_v58 = vadd.f32 %v2066_v44, %v2010_v1  ;;  %v2240_v38 = vpop.permute.xlu0 %2239 }
 0x24b   : > { %v2015_v23 = vadd.f32 %v2731_v52, %v1922_v26  ;;  %v1994_v31 = vpop.f32.mrf.mxu0 }
 0x24c   : > { %2966 = vpow2.f32 %v2496_v17  ;;  %v2499_v39 = vmul.f32 -1.442695, %v3732_v20  ;;  %v3736_v27 = vadd.f32 %v2495_v22, %v2095_v58  ;;  %v2013_v33 = vadd.f32 %v1994_v31, %v1920_v3  ;;  %v2244_v14 = vpop.permute.xlu1 %2243 }
 0x24d   : > { %v2100_v42 = vadd.f32 %v2741_v16, %v2015_v23  ;;  %v2732_v7 = vpop.f32.mrf.mxu0 }
 0x24e   : > { %2968 = vpow2.f32 %v2499_v39  ;;  %v2497_v48 = vmul.f32 -1.442695, %v3736_v27  ;;  %v2098_v62 = vadd.f32 %v2079_v30, %v2013_v33  ;;  %v2016_v13 = vadd.f32 %v2732_v7, %v1923_v11 }
 0x24f   : > { %v3740_v61 = vadd.f32 %v2495_v22, %v2100_v42  ;;  %v1997_v12 = vpop.f32.mrf.mxu0 }
 0x250   : > { %2970 = vpow2.f32 %v2497_v48  ;;  %v3742_v21 = vadd.f32 %v2495_v22, %v2098_v62  ;;  %v2101_v5 = vadd.f32 %v2742_v46, %v2016_v13  ;;  %v2014_v0 = vadd.f32 %v1997_v12, %v1921_v56  ;;  %v2248_v31 = vpop.permute.xlu1 %2247 }
 0x251   : > { %v2502_v49 = vmul.f32 -1.442695, %v3740_v61 }
 0x252   : > { %v2500_v51 = vmul.f32 -1.442695, %v3742_v21  ;;  %v3746_v44 = vadd.f32 %v2495_v22, %v2101_v5  ;;  %v2099_v40 = vadd.f32 %v2082_v55, %v2014_v0 }
 0x253   : > { %2972 = vpow2.f32 %v2502_v49 }
 0x254   : > { %2974 = vpow2.f32 %v2500_v51  ;;  %v2503_v43 = vmul.f32 -1.442695, %v3746_v44  ;;  %v3749_v54 = vadd.f32 %v2495_v22, %v2099_v40  ;;  %v2252_v56 = vpop.permute.xlu1 %2251 }
 0x256   : > { %2976 = vpow2.f32 %v2503_v43  ;;  %v2501_v15 = vmul.f32 -1.442695, %v3749_v54 }
 0x257   : > { %v2965_v36 = vpop.eup %2964 }
 0x258   : > { %v2143_v41 = vadd.f32 1.0, %v2965_v36  ;;  %2978 = vpow2.f32 %v2501_v15 }
 0x259   : > { %v2967_v18 = vpop.eup %2966 }
 0x25a   : > { %2980 = vrcp.f32 %v2143_v41  ;;  %v2141_v47 = vadd.f32 1.0, %v2967_v18 }
 0x25b   : > { %v2969_v34 = vpop.eup %2968 }
 0x25c   : > { %2982 = vrcp.f32 %v2141_v47  ;;  %v2144_v10 = vadd.f32 1.0, %v2969_v34 }
 0x25d   : > { %v2971_v25 = vpop.eup %2970 }
 0x25e   : > { %2984 = vrcp.f32 %v2144_v10  ;;  %v2142_v59 = vadd.f32 1.0, %v2971_v25 }
 0x260   : > { %v2973_v35 = vpop.eup %2972  ;;  %2986 = vrcp.f32 %v2142_v59 }
 0x261   : > { %v2975_v22 = vpop.eup %2974  ;;  %v2147_v16 = vadd.f32 1.0, %v2973_v35 }
 0x262   : > { %v2145_v60 = vadd.f32 1.0, %v2975_v22 }
 0x263   : > { %v2977_v28 = vpop.eup %2976  ;;  %2988 = vrcp.f32 %v2147_v16 }
 0x264   : > { %2990 = vrcp.f32 %v2145_v60  ;;  %v2148_v2 = vadd.f32 1.0, %v2977_v28 }
 0x265   : > { %v2979_v29 = vpop.eup %2978 }
 0x266   : > { %2992 = vrcp.f32 %v2148_v2  ;;  %v2146_v37 = vadd.f32 1.0, %v2979_v29 }
 0x267   : > { %v2981_v8 = vpop.eup %2980 }
 0x268   : > { %v2167_v53 = vmul.f32 %v2981_v8, %v3722_v57  ;;  %2994 = vrcp.f32 %v2146_v37 }
 0x269   : > { %v2983_v50 = vpop.eup %2982 }
 0x26a   : > { %v2528_v32 = vpack.c.bf16 %v2167_v53, %v2167_v53  ;;  %v2165_v1 = vmul.f32 %v2983_v50, %v3727_v9  ;;  %v2246_v9 = vpop.permute.xlu0 %2245 }
 0x26b   : > { %v2985_v30 = vpop.eup %2984 }
 0x26c   : > { %v2526_v57 = vpack.c.bf16 %v2165_v1, %v2165_v1  ;;  %2207 = vst.msk [vmem:[%s3757_s17 + $0x8] sm:$0xf] %vm350_vm2, %v2528_v32  ;;  %v2168_v63 = vmul.f32 %v2985_v30, %v3732_v20 }
 0x26d   : > { %v2987_v26 = vpop.eup %2986  ;;  %2264 = vst.msk [vmem:[%s3757_s17 + $0x8] sm:$0xf] %vm2261_vm10, %v2242_v19 }
 0x26e   : > { %2205 = vst.msk [vmem:[%s3757_s17] sm:$0xf] %vm350_vm2, %v2526_v57  ;;  %v2529_v52 = vpack.c.bf16 %v2168_v63, %v2168_v63  ;;  %v2166_v45 = vmul.f32 %v2987_v26, %v3736_v27  ;;  %v2250_v46 = vpop.permute.xlu0 %2249 }
 0x26f   : > { %2262 = vst.msk [vmem:[%s3757_s17] sm:$0xf] %vm2261_vm10, %v2238_v4 }
 0x270   : > { %v2989_v3 = vpop.eup %2988  ;;  %2208 = vst.msk [vmem:[%s3757_s17 + $0xc] sm:$0xf] %vm350_vm2, %v2529_v52  ;;  %v2527_v17 = vpack.c.bf16 %v2166_v45, %v2166_v45 }
 0x271   : > { %v2991_v20 = vpop.eup %2990  ;;  %2265 = vst.msk [vmem:[%s3757_s17 + $0xc] sm:$0xf] %vm2261_vm10, %v2244_v14  ;;  %v2171_v58 = vmul.f32 %v2989_v3, %v3740_v61 }
 0x272   : > { %2206 = vst.msk [vmem:[%s3757_s17 + $0x4] sm:$0xf] %vm350_vm2, %v2527_v17  ;;  %v2169_v23 = vmul.f32 %v2991_v20, %v3742_v21 }
 0x273   : > { %v2993_v24 = vpop.eup %2992  ;;  %2263 = vst.msk [vmem:[%s3757_s17 + $0x4] sm:$0xf] %vm2261_vm10, %v2240_v38  ;;  %v2532_v11 = vpack.c.bf16 %v2171_v58, %v2171_v58 }
 0x274   : > { %v2530_v39 = vpack.c.bf16 %v2169_v23, %v2169_v23  ;;  %v2172_v27 = vmul.f32 %v2993_v24, %v3746_v44 }
 0x275   : > { %v2995_v33 = vpop.eup %2994  ;;  %2211 = vst.msk [vmem:[%s3757_s17 + $0x18] sm:$0xf] %vm350_vm2, %v2532_v11 }
 0x276   : > { %2209 = vst.msk [vmem:[%s3757_s17 + $0x10] sm:$0xf] %vm350_vm2, %v2530_v39  ;;  %v2533_v42 = vpack.c.bf16 %v2172_v27, %v2172_v27  ;;  %v2170_v7 = vmul.f32 %v2995_v33, %v3749_v54 }
 0x277   : > { %2268 = vst.msk [vmem:[%s3757_s17 + $0x18] sm:$0xf] %vm2261_vm10, %v2250_v46  ;;  %2266 = vst.msk [vmem:[%s3757_s17 + $0x10] sm:$0xf] %vm2261_vm10, %v2246_v9 }
 0x278   : > { %2212 = vst.msk [vmem:[%s3757_s17 + $0x1c] sm:$0xf] %vm350_vm2, %v2533_v42  ;;  %v2531_v6 = vpack.c.bf16 %v2170_v7, %v2170_v7 }
 0x279   : > { %2269 = vst.msk [vmem:[%s3757_s17 + $0x1c] sm:$0xf] %vm2261_vm10, %v2252_v56 }
 0x27a   : > { %2210 = vst.msk [vmem:[%s3757_s17 + $0x14] sm:$0xf] %vm350_vm2, %v2531_v6 }
 0x27b   : > { %2267 = vst.msk [vmem:[%s3757_s17 + $0x14] sm:$0xf] %vm2261_vm10, %v2248_v31 }
 0x27c PF: > { %s18_s29 = sadd.s32 1, %s3018_s29   ;;  %s3826_s27 = smov %s3014_s28 }
 0x27d   : > { %p15_p5 = scmp.ge.s32.totalorder %s18_s29, 4   ;;  %s3827_s28 = smov %s3829_s30 }
 0x27f   :  { %17 = sbr.rel (!%p15_p5) target bundleno = 2 (0x2), region = 87 }

</bundles_post_ra>
